<compile_context>
chip_gen: v7x
topology: tpu7x:2x2x1
jax: 0.10.0
libtpu: 0.0.40
codegen_flags: <defaults>
</compile_context>

<pallas_src>
import math

import numpy as np

import jax
import jax.numpy as jnp
from jax.experimental import pallas as pl
from jax.experimental.pallas import tpu as pltpu

# ----- toy config (shrunk, mirrors cfg.ModelConfig of the toy model) -----
VOCAB = 160
NUM_LAYERS = 2
MAX_SEQ_LEN = 16                 # S == KV_CACHE_MAX_LEN
EMBED_DIM = 32                   # D
NUM_HEADS = 4
NUM_KV = 2                       # num_query_groups (GQA)
HEAD_DIM = EMBED_DIM // NUM_HEADS    # 8
ROT_DIM = HEAD_DIM               # rotary_percentage = 1.0
INTERMEDIATE = 64
EPS = 1e-5
BATCH = 2
SEQ = 8                          # T

WQ = NUM_HEADS * HEAD_DIM        # 32
WK = NUM_KV * HEAD_DIM           # 16
PROJ = 2 * WQ + 3 * WK           # 112: fused [q | k | v | rot_half(q) | rot_half(k)]
Q_PER_KV = NUM_HEADS // NUM_KV   # 2
V_PAD = 256                      # lm_head lane padding (multiple of 128)
NEG_BIG = -1e30                  # finite "minus infinity" for the causal mask
LOG_T = SEQ.bit_length() - 1     # T and S are powers of two
LOG_S = MAX_SEQ_LEN.bit_length() - 1


def _rmsnorm(x, w):
  var = jnp.mean(x * x, axis=-1, keepdims=True)
  return x * jax.lax.rsqrt(var + EPS) * w


# ------------------------- the single fused kernel -------------------------

def _model_kernel(pos_ref,                        # (T,) int32 in SMEM
                  x_ref, cosq_ref, sinq_ref,      # (B*T, D), (B*T, WQ) x2
                  kin_ref, vin_ref,               # (L, B, S, WK)
                  norms_ref,                      # (L, 2, D): attn / ff norm weights
                  wproj_ref, wo_ref,              # (L, D, PROJ), (L, WQ, D)
                  w13_ref, w2_ref,                # (L, D, 2I), (L, I, D)
                  fnorm_ref, lm_ref,              # (1, D), (D, V_PAD)
                  logits_ref, kout_ref, vout_ref):
  B, T, S, HD = BATCH, SEQ, MAX_SEQ_LEN, HEAD_DIM
  pos0 = pos_ref[0]
  scale = 1.0 / math.sqrt(HD)

  x = x_ref[...]                                  # (B*T, D)
  cos_q = cosq_ref[...]                           # (B*T, WQ)
  sin_q = sinq_ref[...]
  cos_k = cos_q[:, :WK]                           # per-head pattern repeats -> kv heads
  sin_k = sin_q[:, :WK]

  # ---- attention bias over [old cache cols (B*S) | fresh cols (B*T)], built once ----
  # old cache columns: allowed iff same batch and cache position < pos0
  r_o = jax.lax.broadcasted_iota(jnp.int32, (B * T, B * S), 0)
  c_o = jax.lax.broadcasted_iota(jnp.int32, (B * T, B * S), 1)
  ok_old = jnp.logical_and(
      jnp.right_shift(r_o, LOG_T) == jnp.right_shift(c_o, LOG_S),
      jnp.bitwise_and(c_o, S - 1) < pos0)
  # fresh columns: allowed iff same batch and key token <= query token (causal)
  r_n = jax.lax.broadcasted_iota(jnp.int32, (B * T, B * T), 0)
  c_n = jax.lax.broadcasted_iota(jnp.int32, (B * T, B * T), 1)
  ok_new = jnp.logical_and(
      jnp.right_shift(r_n, LOG_T) == jnp.right_shift(c_n, LOG_T),
      jnp.bitwise_and(c_n, T - 1) <= jnp.bitwise_and(r_n, T - 1))
  bias = jnp.concatenate(
      [jnp.where(ok_old, 0.0, NEG_BIG), jnp.where(ok_new, 0.0, NEG_BIG)],
      axis=1).astype(jnp.float32)                 # (B*T, B*(S+T)) = (16, 48)
  bias2 = jnp.concatenate([bias, bias], axis=0)   # for the 2 sublane-stacked heads

  for l in range(NUM_LAYERS):                     # fully unrolled (L == 2)
    norms = norms_ref[l]                          # (2, D)
    attn_nw = norms[0:1, :]
    ff_nw = norms[1:2, :]

    # --- pre-attention RMSNorm + fused projection (q|k|v|rot(q)|rot(k)) ---
    xn = _rmsnorm(x, attn_nw)
    proj = jnp.dot(xn, wproj_ref[l], preferred_element_type=jnp.float32)  # (B*T, 112)
    q = proj[:, :WQ] * cos_q + proj[:, WQ + 2 * WK:2 * WQ + 2 * WK] * sin_q
    k = proj[:, WQ:WQ + WK] * cos_k + proj[:, 2 * WQ + 2 * WK:] * sin_k
    v = proj[:, WQ + WK:WQ + 2 * WK]

    # old cache rows (single load each, feed both attention and writeback)
    kold = [kin_ref[l, b, :, :] for b in range(B)]          # each (S, WK)
    vold = [vin_ref[l, b, :, :] for b in range(B)]

    # --- KV-cache writeback (off the attention critical path) ---
    # TODO(synk): assumes input_pos is a contiguous run starting at input_pos[0]
    # (standard prefill/decode); arbitrary scatter positions need per-row DMA.
    for b in range(B):
      kout_ref[l, b, :, :] = kold[b]
      vout_ref[l, b, :, :] = vold[b]
      kout_ref[l, b, pl.ds(pos0, T), :] = k[b * T:(b + 1) * T, :]
      vout_ref[l, b, pl.ds(pos0, T), :] = v[b * T:(b + 1) * T, :]

    # --- attention: keys = [old rows of both batches | fresh rows appended] ---
    # bias makes this equivalent to attending over the updated cache.
    k_att = jnp.concatenate(kold + [k], axis=0)             # (B*S + B*T, WK) = (48, 16)
    v_att = jnp.concatenate(vold + [v], axis=0)

    ctx_parts = []
    for g in range(NUM_KV):                                  # 2 GQA groups
      h0 = g * Q_PER_KV
      # stack the group's 2 query heads along sublanes -> one score/PV matmul each
      qg = jnp.concatenate(
          [q[:, (h0 + i) * HD:(h0 + i + 1) * HD] for i in range(Q_PER_KV)],
          axis=0)                                            # (2*B*T, HD) = (32, 8)
      kg = k_att[:, g * HD:(g + 1) * HD]                     # (48, 8)
      vg = v_att[:, g * HD:(g + 1) * HD]
      s = jax.lax.dot_general(qg, kg, (((1,), (1,)), ((), ())),
                              preferred_element_type=jnp.float32) * scale + bias2
      m = jnp.max(s, axis=-1, keepdims=True)
      e = jnp.exp(s - m)
      p = e * pl.reciprocal(jnp.sum(e, axis=-1, keepdims=True), approx=True)
      o = jnp.dot(p, vg, preferred_element_type=jnp.float32)  # (32, 8)
      for i in range(Q_PER_KV):
        ctx_parts.append(o[i * B * T:(i + 1) * B * T, :])     # head h0+i context
    ctx = jnp.concatenate(ctx_parts, axis=1)                  # (B*T, WQ) head-major
    x = x + jnp.dot(ctx, wo_ref[l], preferred_element_type=jnp.float32)

    # --- gated feed-forward: w2(silu(w1(x)) * w3(x)) with fused w1|w3 ---
    xn2 = _rmsnorm(x, ff_nw)
    h13 = jnp.dot(xn2, w13_ref[l], preferred_element_type=jnp.float32)    # (B*T, 2I)
    h1 = h13[:, :INTERMEDIATE]
    h3 = h13[:, INTERMEDIATE:]
    x = x + jnp.dot(h1 * jax.lax.logistic(h1) * h3, w2_ref[l],
                    preferred_element_type=jnp.float32)

  # --- final RMSNorm + lm_head (lane-dense padded output) ---
  xf = _rmsnorm(x, fnorm_ref[...])
  logits_ref[...] = jnp.dot(xf, lm_ref[...], preferred_element_type=jnp.float32)


# ------------------------- wrapper -------------------------

def toy_model_forward(params, idx, input_pos, k_caches, v_caches):
  """Mirrors ToyModelWithExternalKV.forward (contiguous input_pos)."""
  B, T = idx.shape
  L, S, D = NUM_LAYERS, MAX_SEQ_LEN, EMBED_DIM

  # token embedding (gather kept as glue)
  x = jnp.take(params["tok_embedding"], idx, axis=0).reshape(B * T, D)

  # rope cos/sin tables precomputed in init; only the gather + batch tile here
  cos_q = jnp.tile(params["cos_table"][input_pos], (B, 1))   # (B*T, WQ)
  sin_q = jnp.tile(params["sin_table"][input_pos], (B, 1))

  kc = k_caches.reshape(L, B, S, WK)
  vc = v_caches.reshape(L, B, S, WK)

  smem = pl.BlockSpec(memory_space=pltpu.MemorySpace.SMEM)
  vmem = pl.BlockSpec(memory_space=pltpu.MemorySpace.VMEM)

  in_specs = [
      smem,                  # input_pos
      vmem, vmem, vmem,      # x, cos_q, sin_q
      vmem, vmem,            # k cache, v cache
      vmem,                  # norm weights (attn + ff)
      vmem, vmem,            # fused W[q|k|v|rotq|rotk]^T, Wo^T
      vmem, vmem,            # fused W1|W3 ^T, W2^T
      vmem, vmem,            # final norm weight, lm_head^T (padded)
  ]
  out_specs = (vmem, vmem, vmem)
  out_shape = (
      jax.ShapeDtypeStruct((B * T, V_PAD), jnp.float32),
      jax.ShapeDtypeStruct((L, B, S, WK), jnp.float32),
      jax.ShapeDtypeStruct((L, B, S, WK), jnp.float32),
  )

  logits_pad, k_new, v_new = pl.pallas_call(
      _model_kernel,
      in_specs=in_specs,
      out_specs=out_specs,
      out_shape=out_shape,
      input_output_aliases={4: 1, 5: 2},   # k/v caches updated "in place"
      compiler_params=pltpu.CompilerParams(vmem_limit_bytes=32 * 1024 * 1024),
  )(input_pos, x, cos_q, sin_q, kc, vc,
    params["norms"], params["wproj_t"], params["wo_t"],
    params["w13_t"], params["w2_t"],
    params["final_norm_w"], params["lm_head_pad"])

  logits = logits_pad[:, :VOCAB].reshape(B, T, VOCAB)
  return (logits,
          k_new.reshape(L, B, S, NUM_KV, HEAD_DIM),
          v_new.reshape(L, B, S, NUM_KV, HEAD_DIM))


# ------------------------- parameter init -------------------------

def _rot_half_perm(width):
  """Signed permutation P with (x @ P) == rotate_half(x) applied per head."""
  half = HEAD_DIM // 2
  p = np.zeros((width, width), np.float32)
  for h in range(width // HEAD_DIM):
    base = h * HEAD_DIM
    for i in range(half):
      p[base + i + half, base + i] = -1.0      # out[i]        = -x[i + half]
      p[base + i, base + i + half] = 1.0       # out[i + half] =  x[i]
  return jnp.asarray(p)


def init_params(key):
  def nrm(k, shape):
    return jax.random.normal(k, shape, jnp.float32) * 0.02

  ks = jax.random.split(key, 8)
  wq_t = nrm(ks[0], (NUM_LAYERS, EMBED_DIM, WQ))
  wk_t = nrm(ks[1], (NUM_LAYERS, EMBED_DIM, WK))
  wv_t = nrm(ks[2], (NUM_LAYERS, EMBED_DIM, WK))
  pq = _rot_half_perm(WQ)
  pk = _rot_half_perm(WK)
  # rotate_half folded into the projection: xn @ (W^T @ P) == rotate_half(xn @ W^T)
  wproj_t = jnp.concatenate(
      [wq_t, wk_t, wv_t,
       jnp.einsum("ldq,qr->ldr", wq_t, pq),
       jnp.einsum("ldk,kr->ldr", wk_t, pk)], axis=-1)        # (L, D, PROJ)

  lm_head_t = nrm(ks[3], (EMBED_DIM, VOCAB))                 # Linear(D, V).weight^T
  lm_head_pad = jnp.zeros((EMBED_DIM, V_PAD), jnp.float32).at[:, :VOCAB].set(lm_head_t)

  # rope cache (attn_utils.build_rope_cache), pre-tiled over query heads: (S, WQ)
  theta = 1.0 / (10000.0 ** (jnp.arange(0, ROT_DIM, 2, dtype=jnp.float32) / ROT_DIM))
  idx_theta = jnp.outer(jnp.arange(MAX_SEQ_LEN, dtype=jnp.float32), theta)
  cos2 = jnp.concatenate([jnp.cos(idx_theta)] * 2, axis=-1)  # (S, HEAD_DIM)
  sin2 = jnp.concatenate([jnp.sin(idx_theta)] * 2, axis=-1)
  cos_table = jnp.tile(cos2, (1, NUM_HEADS))                 # (S, WQ)
  sin_table = jnp.tile(sin2, (1, NUM_HEADS))

  return {
      "tok_embedding": nrm(ks[4], (VOCAB, EMBED_DIM)),       # nn.Embedding(V, D)
      "lm_head_pad": lm_head_pad,
      "final_norm_w": jnp.ones((1, EMBED_DIM), jnp.float32),
      "norms": jnp.ones((NUM_LAYERS, 2, EMBED_DIM), jnp.float32),
      "wproj_t": wproj_t,
      "wo_t": nrm(ks[5], (NUM_LAYERS, WQ, EMBED_DIM)),
      "w13_t": nrm(ks[6], (NUM_LAYERS, EMBED_DIM, 2 * INTERMEDIATE)),
      "w2_t": nrm(ks[7], (NUM_LAYERS, INTERMEDIATE, EMBED_DIM)),
      "cos_table": cos_table,
      "sin_table": sin_table,
  }


if __name__ == "__main__":
  root = jax.random.PRNGKey(0)
  k_param, k_idx = jax.random.split(root)
  params = init_params(k_param)

  idx = jax.random.randint(k_idx, (BATCH, SEQ), 0, VOCAB, dtype=jnp.int32)
  input_pos = jnp.arange(SEQ, dtype=jnp.int32)
  k_caches = jnp.zeros((NUM_LAYERS, BATCH, MAX_SEQ_LEN, NUM_KV, HEAD_DIM),
                       jnp.float32)
  v_caches = jnp.zeros_like(k_caches)

  fwd = jax.jit(toy_model_forward)
  logits, k_new, v_new = fwd(params, idx, input_pos, k_caches, v_caches)
  jax.block_until_ready((logits, k_new, v_new))

  assert logits.shape == (BATCH, SEQ, VOCAB)
  assert k_new.shape == k_caches.shape and v_new.shape == v_caches.shape
  assert bool(jnp.all(jnp.isfinite(logits)))
  assert bool(jnp.all(jnp.isfinite(k_new))) and bool(jnp.all(jnp.isfinite(v_new)))
  print("KERNEL_OK")
</pallas_src>

<mosaic_0001>
module attributes {stable_mosaic.version = 11 : i64} {
  func.func @_model_kernel(%arg0: memref<8xi32, #tpu.memory_space<smem>>, %arg1: memref<16x32xf32, #tpu.memory_space<vmem>>, %arg2: memref<16x32xf32, #tpu.memory_space<vmem>>, %arg3: memref<16x32xf32, #tpu.memory_space<vmem>>, %arg4: memref<2x2x16x16xf32, #tpu.memory_space<vmem>>, %arg5: memref<2x2x16x16xf32, #tpu.memory_space<vmem>>, %arg6: memref<2x2x32xf32, #tpu.memory_space<vmem>>, %arg7: memref<2x32x112xf32, #tpu.memory_space<vmem>>, %arg8: memref<2x32x32xf32, #tpu.memory_space<vmem>>, %arg9: memref<2x32x128xf32, #tpu.memory_space<vmem>>, %arg10: memref<2x64x32xf32, #tpu.memory_space<vmem>>, %arg11: memref<1x32xf32, #tpu.memory_space<vmem>>, %arg12: memref<32x256xf32, #tpu.memory_space<vmem>>, %arg13: memref<16x256xf32, #tpu.memory_space<vmem>>, %arg14: memref<2x2x16x16xf32, #tpu.memory_space<vmem>>, %arg15: memref<2x2x16x16xf32, #tpu.memory_space<vmem>>) attributes {dimension_semantics = [], scalar_prefetch = 0 : i64, scratch_operands = 0 : i64, tpu.core_type = #tpu.core_type<tc>} {
    %c0 = arith.constant 0 : index
    %0 = memref.load %arg0[%c0] : memref<8xi32, #tpu.memory_space<smem>>
    %c0_0 = arith.constant 0 : index
    %c0_1 = arith.constant 0 : index
    %1 = vector.load %arg1[%c0_0, %c0_1] : memref<16x32xf32, #tpu.memory_space<vmem>>, vector<16x32xf32>
    %c0_2 = arith.constant 0 : index
    %c0_3 = arith.constant 0 : index
    %2 = vector.load %arg2[%c0_2, %c0_3] : memref<16x32xf32, #tpu.memory_space<vmem>>, vector<16x32xf32>
    %c0_4 = arith.constant 0 : index
    %c0_5 = arith.constant 0 : index
    %3 = vector.load %arg3[%c0_4, %c0_5] : memref<16x32xf32, #tpu.memory_space<vmem>>, vector<16x32xf32>
    %4 = vector.extract_strided_slice %2 {offsets = [0, 0], sizes = [16, 16], strides = [1, 1]} : vector<16x32xf32> to vector<16x16xf32>
    %5 = vector.extract_strided_slice %3 {offsets = [0, 0], sizes = [16, 16], strides = [1, 1]} : vector<16x32xf32> to vector<16x16xf32>
    %6 = tpu.iota {dimensions = array<i32: 0>} : vector<16x32xi32>
    %7 = tpu.iota {dimensions = array<i32: 1>} : vector<16x32xi32>
    %c3_i32 = arith.constant 3 : i32
    %8 = vector.broadcast %c3_i32 : i32 to vector<16x32xi32>
    %9 = arith.shrsi %6, %8 : vector<16x32xi32>
    %c4_i32 = arith.constant 4 : i32
    %10 = vector.broadcast %c4_i32 : i32 to vector<16x32xi32>
    %11 = arith.shrsi %7, %10 : vector<16x32xi32>
    %12 = arith.cmpi eq, %9, %11 : vector<16x32xi32>
    %c15_i32 = arith.constant 15 : i32
    %13 = vector.broadcast %c15_i32 : i32 to vector<16x32xi32>
    %14 = arith.andi %7, %13 : vector<16x32xi32>
    %15 = vector.broadcast %0 : i32 to vector<16x32xi32>
    %16 = arith.cmpi slt, %14, %15 : vector<16x32xi32>
    %17 = arith.andi %12, %16 : vector<16x32xi1>
    %18 = tpu.iota {dimensions = array<i32: 0>} : vector<16x16xi32>
    %19 = tpu.iota {dimensions = array<i32: 1>} : vector<16x16xi32>
    %c3_i32_6 = arith.constant 3 : i32
    %20 = vector.broadcast %c3_i32_6 : i32 to vector<16x16xi32>
    %21 = arith.shrsi %18, %20 : vector<16x16xi32>
    %c3_i32_7 = arith.constant 3 : i32
    %22 = vector.broadcast %c3_i32_7 : i32 to vector<16x16xi32>
    %23 = arith.shrsi %19, %22 : vector<16x16xi32>
    %24 = arith.cmpi eq, %21, %23 : vector<16x16xi32>
    %c7_i32 = arith.constant 7 : i32
    %25 = vector.broadcast %c7_i32 : i32 to vector<16x16xi32>
    %26 = arith.andi %19, %25 : vector<16x16xi32>
    %c7_i32_8 = arith.constant 7 : i32
    %27 = vector.broadcast %c7_i32_8 : i32 to vector<16x16xi32>
    %28 = arith.andi %18, %27 : vector<16x16xi32>
    %29 = arith.cmpi sle, %26, %28 : vector<16x16xi32>
    %30 = arith.andi %24, %29 : vector<16x16xi1>
    %cst = arith.constant 0.000000e+00 : f32
    %cst_9 = arith.constant -1.000000e+30 : f32
    %31 = vector.broadcast %cst : f32 to vector<16x32xf32>
    %32 = vector.broadcast %cst_9 : f32 to vector<16x32xf32>
    %33 = arith.select %17, %31, %32 : vector<16x32xi1>, vector<16x32xf32>
    %cst_10 = arith.constant 0.000000e+00 : f32
    %cst_11 = arith.constant -1.000000e+30 : f32
    %34 = vector.broadcast %cst_10 : f32 to vector<16x16xf32>
    %35 = vector.broadcast %cst_11 : f32 to vector<16x16xf32>
    %36 = arith.select %30, %34, %35 : vector<16x16xi1>, vector<16x16xf32>
    %37 = tpu.concatenate %33, %36 in 1 : vector<16x32xf32>, vector<16x16xf32> -> vector<16x48xf32>
    %38 = tpu.concatenate %37, %37 in 0 : vector<16x48xf32>, vector<16x48xf32> -> vector<32x48xf32>
    %c0_12 = arith.constant 0 : index
    %c0_13 = arith.constant 0 : index
    %c0_14 = arith.constant 0 : index
    %39 = vector.load %arg6[%c0_12, %c0_13, %c0_14] : memref<2x2x32xf32, #tpu.memory_space<vmem>>, vector<1x2x32xf32>
    %40 = vector.shape_cast %39 : vector<1x2x32xf32> to vector<2x32xf32>
    %41 = vector.extract_strided_slice %40 {offsets = [0, 0], sizes = [1, 32], strides = [1, 1]} : vector<2x32xf32> to vector<1x32xf32>
    %42 = vector.extract_strided_slice %40 {offsets = [1, 0], sizes = [1, 32], strides = [1, 1]} : vector<2x32xf32> to vector<1x32xf32>
    %43 = arith.mulf %1, %1 : vector<16x32xf32>
    %cst_15 = arith.constant dense<0.000000e+00> : vector<16xf32>
    %44 = vector.multi_reduction <add>, %43, %cst_15 [1] : vector<16x32xf32> to vector<16xf32>
    %45 = vector.shape_cast %44 : vector<16xf32> to vector<16x1xf32>
    %cst_16 = arith.constant 3.200000e+01 : f32
    %46 = vector.broadcast %cst_16 : f32 to vector<16x1xf32>
    %47 = arith.divf %45, %46 : vector<16x1xf32>
    %cst_17 = arith.constant 9.99999974E-6 : f32
    %48 = vector.broadcast %cst_17 : f32 to vector<16x1xf32>
    %49 = arith.addf %47, %48 : vector<16x1xf32>
    %50 = math.rsqrt %49 : vector<16x1xf32>
    %51 = vector.broadcast %50 : vector<16x1xf32> to vector<16x32xf32>
    %52 = arith.mulf %1, %51 : vector<16x32xf32>
    %53 = vector.broadcast %41 : vector<1x32xf32> to vector<16x32xf32>
    %54 = arith.mulf %52, %53 : vector<16x32xf32>
    %c0_18 = arith.constant 0 : index
    %c0_19 = arith.constant 0 : index
    %c0_20 = arith.constant 0 : index
    %55 = vector.load %arg7[%c0_18, %c0_19, %c0_20] : memref<2x32x112xf32, #tpu.memory_space<vmem>>, vector<1x32x112xf32>
    %56 = vector.shape_cast %55 : vector<1x32x112xf32> to vector<32x112xf32>
    %cst_21 = arith.constant dense<0.000000e+00> : vector<16x112xf32>
    %57 = tpu.matmul %54, %56, %cst_21 {dimension_numbers = #tpu.dot_dimension_numbers<[1], [0], [0], [1], [0, 0, 1, 1], [], []>} : vector<16x32xf32>, vector<32x112xf32>, vector<16x112xf32> -> vector<16x112xf32>
    %58 = vector.extract_strided_slice %57 {offsets = [0, 0], sizes = [16, 32], strides = [1, 1]} : vector<16x112xf32> to vector<16x32xf32>
    %59 = arith.mulf %58, %2 : vector<16x32xf32>
    %60 = vector.extract_strided_slice %57 {offsets = [0, 64], sizes = [16, 32], strides = [1, 1]} : vector<16x112xf32> to vector<16x32xf32>
    %61 = arith.mulf %60, %3 : vector<16x32xf32>
    %62 = arith.addf %59, %61 : vector<16x32xf32>
    %63 = vector.extract_strided_slice %57 {offsets = [0, 32], sizes = [16, 16], strides = [1, 1]} : vector<16x112xf32> to vector<16x16xf32>
    %64 = arith.mulf %63, %4 : vector<16x16xf32>
    %65 = vector.extract_strided_slice %57 {offsets = [0, 96], sizes = [16, 16], strides = [1, 1]} : vector<16x112xf32> to vector<16x16xf32>
    %66 = arith.mulf %65, %5 : vector<16x16xf32>
    %67 = arith.addf %64, %66 : vector<16x16xf32>
    %68 = vector.extract_strided_slice %57 {offsets = [0, 48], sizes = [16, 16], strides = [1, 1]} : vector<16x112xf32> to vector<16x16xf32>
    %c0_22 = arith.constant 0 : index
    %c0_23 = arith.constant 0 : index
    %c0_24 = arith.constant 0 : index
    %c0_25 = arith.constant 0 : index
    %69 = vector.load %arg4[%c0_22, %c0_23, %c0_24, %c0_25] : memref<2x2x16x16xf32, #tpu.memory_space<vmem>>, vector<1x1x16x16xf32>
    %70 = vector.shape_cast %69 : vector<1x1x16x16xf32> to vector<16x16xf32>
    %c0_26 = arith.constant 0 : index
    %c1 = arith.constant 1 : index
    %c0_27 = arith.constant 0 : index
    %c0_28 = arith.constant 0 : index
    %71 = vector.load %arg4[%c0_26, %c1, %c0_27, %c0_28] : memref<2x2x16x16xf32, #tpu.memory_space<vmem>>, vector<1x1x16x16xf32>
    %72 = vector.shape_cast %71 : vector<1x1x16x16xf32> to vector<16x16xf32>
    %c0_29 = arith.constant 0 : index
    %c0_30 = arith.constant 0 : index
    %c0_31 = arith.constant 0 : index
    %c0_32 = arith.constant 0 : index
    %73 = vector.load %arg5[%c0_29, %c0_30, %c0_31, %c0_32] : memref<2x2x16x16xf32, #tpu.memory_space<vmem>>, vector<1x1x16x16xf32>
    %74 = vector.shape_cast %73 : vector<1x1x16x16xf32> to vector<16x16xf32>
    %c0_33 = arith.constant 0 : index
    %c1_34 = arith.constant 1 : index
    %c0_35 = arith.constant 0 : index
    %c0_36 = arith.constant 0 : index
    %75 = vector.load %arg5[%c0_33, %c1_34, %c0_35, %c0_36] : memref<2x2x16x16xf32, #tpu.memory_space<vmem>>, vector<1x1x16x16xf32>
    %76 = vector.shape_cast %75 : vector<1x1x16x16xf32> to vector<16x16xf32>
    %c0_37 = arith.constant 0 : index
    %c0_38 = arith.constant 0 : index
    %c0_39 = arith.constant 0 : index
    %c0_40 = arith.constant 0 : index
    %77 = vector.load %arg14[%c0_37, %c0_38, %c0_39, %c0_40] : memref<2x2x16x16xf32, #tpu.memory_space<vmem>>, vector<1x1x16x16xf32>
    %78 = vector.shape_cast %77 : vector<1x1x16x16xf32> to vector<16x16xf32>
    %79 = vector.shape_cast %70 : vector<16x16xf32> to vector<1x1x16x16xf32>
    tpu.vector_store %arg14[%c0_37, %c0_38, %c0_39, %c0_40], %79 {strides = array<i32>} : memref<2x2x16x16xf32, #tpu.memory_space<vmem>>, vector<1x1x16x16xf32>,
    %c0_41 = arith.constant 0 : index
    %c0_42 = arith.constant 0 : index
    %c0_43 = arith.constant 0 : index
    %c0_44 = arith.constant 0 : index
    %80 = vector.load %arg15[%c0_41, %c0_42, %c0_43, %c0_44] : memref<2x2x16x16xf32, #tpu.memory_space<vmem>>, vector<1x1x16x16xf32>
    %81 = vector.shape_cast %80 : vector<1x1x16x16xf32> to vector<16x16xf32>
    %82 = vector.shape_cast %74 : vector<16x16xf32> to vector<1x1x16x16xf32>
    tpu.vector_store %arg15[%c0_41, %c0_42, %c0_43, %c0_44], %82 {strides = array<i32>} : memref<2x2x16x16xf32, #tpu.memory_space<vmem>>, vector<1x1x16x16xf32>,
    %83 = vector.extract_strided_slice %67 {offsets = [0, 0], sizes = [8, 16], strides = [1, 1]} : vector<16x16xf32> to vector<8x16xf32>
    %c0_45 = arith.constant 0 : index
    %c0_46 = arith.constant 0 : index
    %84 = arith.index_cast %0 : i32 to index
    %c0_47 = arith.constant 0 : index
    %85 = vector.load %arg14[%c0_45, %c0_46, %84, %c0_47] : memref<2x2x16x16xf32, #tpu.memory_space<vmem>>, vector<1x1x8x16xf32>
    %86 = vector.shape_cast %85 : vector<1x1x8x16xf32> to vector<8x16xf32>
    %87 = vector.shape_cast %83 : vector<8x16xf32> to vector<1x1x8x16xf32>
    tpu.vector_store %arg14[%c0_45, %c0_46, %84, %c0_47], %87 {strides = array<i32>} : memref<2x2x16x16xf32, #tpu.memory_space<vmem>>, vector<1x1x8x16xf32>,
    %88 = vector.extract_strided_slice %68 {offsets = [0, 0], sizes = [8, 16], strides = [1, 1]} : vector<16x16xf32> to vector<8x16xf32>
    %c0_48 = arith.constant 0 : index
    %c0_49 = arith.constant 0 : index
    %89 = arith.index_cast %0 : i32 to index
    %c0_50 = arith.constant 0 : index
    %90 = vector.load %arg15[%c0_48, %c0_49, %89, %c0_50] : memref<2x2x16x16xf32, #tpu.memory_space<vmem>>, vector<1x1x8x16xf32>
    %91 = vector.shape_cast %90 : vector<1x1x8x16xf32> to vector<8x16xf32>
    %92 = vector.shape_cast %88 : vector<8x16xf32> to vector<1x1x8x16xf32>
    tpu.vector_store %arg15[%c0_48, %c0_49, %89, %c0_50], %92 {strides = array<i32>} : memref<2x2x16x16xf32, #tpu.memory_space<vmem>>, vector<1x1x8x16xf32>,
    %c0_51 = arith.constant 0 : index
    %c1_52 = arith.constant 1 : index
    %c0_53 = arith.constant 0 : index
    %c0_54 = arith.constant 0 : index
    %93 = vector.load %arg14[%c0_51, %c1_52, %c0_53, %c0_54] : memref<2x2x16x16xf32, #tpu.memory_space<vmem>>, vector<1x1x16x16xf32>
    %94 = vector.shape_cast %93 : vector<1x1x16x16xf32> to vector<16x16xf32>
    %95 = vector.shape_cast %72 : vector<16x16xf32> to vector<1x1x16x16xf32>
    tpu.vector_store %arg14[%c0_51, %c1_52, %c0_53, %c0_54], %95 {strides = array<i32>} : memref<2x2x16x16xf32, #tpu.memory_space<vmem>>, vector<1x1x16x16xf32>,
    %c0_55 = arith.constant 0 : index
    %c1_56 = arith.constant 1 : index
    %c0_57 = arith.constant 0 : index
    %c0_58 = arith.constant 0 : index
    %96 = vector.load %arg15[%c0_55, %c1_56, %c0_57, %c0_58] : memref<2x2x16x16xf32, #tpu.memory_space<vmem>>, vector<1x1x16x16xf32>
    %97 = vector.shape_cast %96 : vector<1x1x16x16xf32> to vector<16x16xf32>
    %98 = vector.shape_cast %76 : vector<16x16xf32> to vector<1x1x16x16xf32>
    tpu.vector_store %arg15[%c0_55, %c1_56, %c0_57, %c0_58], %98 {strides = array<i32>} : memref<2x2x16x16xf32, #tpu.memory_space<vmem>>, vector<1x1x16x16xf32>,
    %99 = vector.extract_strided_slice %67 {offsets = [8, 0], sizes = [8, 16], strides = [1, 1]} : vector<16x16xf32> to vector<8x16xf32>
    %c0_59 = arith.constant 0 : index
    %c1_60 = arith.constant 1 : index
    %100 = arith.index_cast %0 : i32 to index
    %c0_61 = arith.constant 0 : index
    %101 = vector.load %arg14[%c0_59, %c1_60, %100, %c0_61] : memref<2x2x16x16xf32, #tpu.memory_space<vmem>>, vector<1x1x8x16xf32>
    %102 = vector.shape_cast %101 : vector<1x1x8x16xf32> to vector<8x16xf32>
    %103 = vector.shape_cast %99 : vector<8x16xf32> to vector<1x1x8x16xf32>
    tpu.vector_store %arg14[%c0_59, %c1_60, %100, %c0_61], %103 {strides = array<i32>} : memref<2x2x16x16xf32, #tpu.memory_space<vmem>>, vector<1x1x8x16xf32>,
    %104 = vector.extract_strided_slice %68 {offsets = [8, 0], sizes = [8, 16], strides = [1, 1]} : vector<16x16xf32> to vector<8x16xf32>
    %c0_62 = arith.constant 0 : index
    %c1_63 = arith.constant 1 : index
    %105 = arith.index_cast %0 : i32 to index
    %c0_64 = arith.constant 0 : index
    %106 = vector.load %arg15[%c0_62, %c1_63, %105, %c0_64] : memref<2x2x16x16xf32, #tpu.memory_space<vmem>>, vector<1x1x8x16xf32>
    %107 = vector.shape_cast %106 : vector<1x1x8x16xf32> to vector<8x16xf32>
    %108 = vector.shape_cast %104 : vector<8x16xf32> to vector<1x1x8x16xf32>
    tpu.vector_store %arg15[%c0_62, %c1_63, %105, %c0_64], %108 {strides = array<i32>} : memref<2x2x16x16xf32, #tpu.memory_space<vmem>>, vector<1x1x8x16xf32>,
    %109 = tpu.concatenate %70, %72, %67 in 0 : vector<16x16xf32>, vector<16x16xf32>, vector<16x16xf32> -> vector<48x16xf32>
    %110 = tpu.concatenate %74, %76, %68 in 0 : vector<16x16xf32>, vector<16x16xf32>, vector<16x16xf32> -> vector<48x16xf32>
    %111 = vector.extract_strided_slice %62 {offsets = [0, 0], sizes = [16, 8], strides = [1, 1]} : vector<16x32xf32> to vector<16x8xf32>
    %112 = vector.extract_strided_slice %62 {offsets = [0, 8], sizes = [16, 8], strides = [1, 1]} : vector<16x32xf32> to vector<16x8xf32>
    %113 = tpu.concatenate %111, %112 in 0 : vector<16x8xf32>, vector<16x8xf32> -> vector<32x8xf32>
    %114 = vector.extract_strided_slice %109 {offsets = [0, 0], sizes = [48, 8], strides = [1, 1]} : vector<48x16xf32> to vector<48x8xf32>
    %115 = vector.extract_strided_slice %110 {offsets = [0, 0], sizes = [48, 8], strides = [1, 1]} : vector<48x16xf32> to vector<48x8xf32>
    %cst_65 = arith.constant dense<0.000000e+00> : vector<32x48xf32>
    %116 = tpu.matmul %113, %114, %cst_65 {dimension_numbers = #tpu.dot_dimension_numbers<[1], [1], [0], [0], [0, 0, 1, 0], [], []>} : vector<32x8xf32>, vector<48x8xf32>, vector<32x48xf32> -> vector<32x48xf32>
    %cst_66 = arith.constant 0.353553385 : f32
    %117 = vector.broadcast %cst_66 : f32 to vector<32x48xf32>
    %118 = arith.mulf %116, %117 : vector<32x48xf32>
    %119 = arith.addf %118, %38 : vector<32x48xf32>
    %cst_67 = arith.constant dense<0xFF800000> : vector<32xf32>
    %120 = vector.multi_reduction <maximumf>, %119, %cst_67 [1] : vector<32x48xf32> to vector<32xf32>
    %121 = vector.shape_cast %120 : vector<32xf32> to vector<32x1xf32>
    %122 = vector.broadcast %121 : vector<32x1xf32> to vector<32x48xf32>
    %123 = arith.subf %119, %122 : vector<32x48xf32>
    %124 = math.exp %123 : vector<32x48xf32>
    %cst_68 = arith.constant dense<0.000000e+00> : vector<32xf32>
    %125 = vector.multi_reduction <add>, %124, %cst_68 [1] : vector<32x48xf32> to vector<32xf32>
    %126 = vector.shape_cast %125 : vector<32xf32> to vector<32x1xf32>
    %127 = tpu.reciprocal %126 {approx = true} : vector<32x1xf32> -> vector<32x1xf32>
    %128 = vector.broadcast %127 : vector<32x1xf32> to vector<32x48xf32>
    %129 = arith.mulf %124, %128 : vector<32x48xf32>
    %cst_69 = arith.constant dense<0.000000e+00> : vector<32x8xf32>
    %130 = tpu.matmul %129, %115, %cst_69 {dimension_numbers = #tpu.dot_dimension_numbers<[1], [0], [0], [1], [0, 0, 1, 1], [], []>} : vector<32x48xf32>, vector<48x8xf32>, vector<32x8xf32> -> vector<32x8xf32>
    %131 = vector.extract_strided_slice %130 {offsets = [0, 0], sizes = [16, 8], strides = [1, 1]} : vector<32x8xf32> to vector<16x8xf32>
    %132 = vector.extract_strided_slice %130 {offsets = [16, 0], sizes = [16, 8], strides = [1, 1]} : vector<32x8xf32> to vector<16x8xf32>
    %133 = vector.extract_strided_slice %62 {offsets = [0, 16], sizes = [16, 8], strides = [1, 1]} : vector<16x32xf32> to vector<16x8xf32>
    %134 = vector.extract_strided_slice %62 {offsets = [0, 24], sizes = [16, 8], strides = [1, 1]} : vector<16x32xf32> to vector<16x8xf32>
    %135 = tpu.concatenate %133, %134 in 0 : vector<16x8xf32>, vector<16x8xf32> -> vector<32x8xf32>
    %136 = vector.extract_strided_slice %109 {offsets = [0, 8], sizes = [48, 8], strides = [1, 1]} : vector<48x16xf32> to vector<48x8xf32>
    %137 = vector.extract_strided_slice %110 {offsets = [0, 8], sizes = [48, 8], strides = [1, 1]} : vector<48x16xf32> to vector<48x8xf32>
    %cst_70 = arith.constant dense<0.000000e+00> : vector<32x48xf32>
    %138 = tpu.matmul %135, %136, %cst_70 {dimension_numbers = #tpu.dot_dimension_numbers<[1], [1], [0], [0], [0, 0, 1, 0], [], []>} : vector<32x8xf32>, vector<48x8xf32>, vector<32x48xf32> -> vector<32x48xf32>
    %cst_71 = arith.constant 0.353553385 : f32
    %139 = vector.broadcast %cst_71 : f32 to vector<32x48xf32>
    %140 = arith.mulf %138, %139 : vector<32x48xf32>
    %141 = arith.addf %140, %38 : vector<32x48xf32>
    %cst_72 = arith.constant dense<0xFF800000> : vector<32xf32>
    %142 = vector.multi_reduction <maximumf>, %141, %cst_72 [1] : vector<32x48xf32> to vector<32xf32>
    %143 = vector.shape_cast %142 : vector<32xf32> to vector<32x1xf32>
    %144 = vector.broadcast %143 : vector<32x1xf32> to vector<32x48xf32>
    %145 = arith.subf %141, %144 : vector<32x48xf32>
    %146 = math.exp %145 : vector<32x48xf32>
    %cst_73 = arith.constant dense<0.000000e+00> : vector<32xf32>
    %147 = vector.multi_reduction <add>, %146, %cst_73 [1] : vector<32x48xf32> to vector<32xf32>
    %148 = vector.shape_cast %147 : vector<32xf32> to vector<32x1xf32>
    %149 = tpu.reciprocal %148 {approx = true} : vector<32x1xf32> -> vector<32x1xf32>
    %150 = vector.broadcast %149 : vector<32x1xf32> to vector<32x48xf32>
    %151 = arith.mulf %146, %150 : vector<32x48xf32>
    %cst_74 = arith.constant dense<0.000000e+00> : vector<32x8xf32>
    %152 = tpu.matmul %151, %137, %cst_74 {dimension_numbers = #tpu.dot_dimension_numbers<[1], [0], [0], [1], [0, 0, 1, 1], [], []>} : vector<32x48xf32>, vector<48x8xf32>, vector<32x8xf32> -> vector<32x8xf32>
    %153 = vector.extract_strided_slice %152 {offsets = [0, 0], sizes = [16, 8], strides = [1, 1]} : vector<32x8xf32> to vector<16x8xf32>
    %154 = vector.extract_strided_slice %152 {offsets = [16, 0], sizes = [16, 8], strides = [1, 1]} : vector<32x8xf32> to vector<16x8xf32>
    %155 = tpu.concatenate %131, %132, %153, %154 in 1 : vector<16x8xf32>, vector<16x8xf32>, vector<16x8xf32>, vector<16x8xf32> -> vector<16x32xf32>
    %c0_75 = arith.constant 0 : index
    %c0_76 = arith.constant 0 : index
    %c0_77 = arith.constant 0 : index
    %156 = vector.load %arg8[%c0_75, %c0_76, %c0_77] : memref<2x32x32xf32, #tpu.memory_space<vmem>>, vector<1x32x32xf32>
    %157 = vector.shape_cast %156 : vector<1x32x32xf32> to vector<32x32xf32>
    %cst_78 = arith.constant dense<0.000000e+00> : vector<16x32xf32>
    %158 = tpu.matmul %155, %157, %cst_78 {dimension_numbers = #tpu.dot_dimension_numbers<[1], [0], [0], [1], [0, 0, 1, 1], [], []>} : vector<16x32xf32>, vector<32x32xf32>, vector<16x32xf32> -> vector<16x32xf32>
    %159 = arith.addf %1, %158 : vector<16x32xf32>
    %160 = arith.mulf %159, %159 : vector<16x32xf32>
    %cst_79 = arith.constant dense<0.000000e+00> : vector<16xf32>
    %161 = vector.multi_reduction <add>, %160, %cst_79 [1] : vector<16x32xf32> to vector<16xf32>
    %162 = vector.shape_cast %161 : vector<16xf32> to vector<16x1xf32>
    %cst_80 = arith.constant 3.200000e+01 : f32
    %163 = vector.broadcast %cst_80 : f32 to vector<16x1xf32>
    %164 = arith.divf %162, %163 : vector<16x1xf32>
    %cst_81 = arith.constant 9.99999974E-6 : f32
    %165 = vector.broadcast %cst_81 : f32 to vector<16x1xf32>
    %166 = arith.addf %164, %165 : vector<16x1xf32>
    %167 = math.rsqrt %166 : vector<16x1xf32>
    %168 = vector.broadcast %167 : vector<16x1xf32> to vector<16x32xf32>
    %169 = arith.mulf %159, %168 : vector<16x32xf32>
    %170 = vector.broadcast %42 : vector<1x32xf32> to vector<16x32xf32>
    %171 = arith.mulf %169, %170 : vector<16x32xf32>
    %c0_82 = arith.constant 0 : index
    %c0_83 = arith.constant 0 : index
    %c0_84 = arith.constant 0 : index
    %172 = vector.load %arg9[%c0_82, %c0_83, %c0_84] : memref<2x32x128xf32, #tpu.memory_space<vmem>>, vector<1x32x128xf32>
    %173 = vector.shape_cast %172 : vector<1x32x128xf32> to vector<32x128xf32>
    %cst_85 = arith.constant dense<0.000000e+00> : vector<16x128xf32>
    %174 = tpu.matmul %171, %173, %cst_85 {dimension_numbers = #tpu.dot_dimension_numbers<[1], [0], [0], [1], [0, 0, 1, 1], [], []>} : vector<16x32xf32>, vector<32x128xf32>, vector<16x128xf32> -> vector<16x128xf32>
    %175 = vector.extract_strided_slice %174 {offsets = [0, 0], sizes = [16, 64], strides = [1, 1]} : vector<16x128xf32> to vector<16x64xf32>
    %176 = vector.extract_strided_slice %174 {offsets = [0, 64], sizes = [16, 64], strides = [1, 1]} : vector<16x128xf32> to vector<16x64xf32>
    %177 = arith.negf %175 : vector<16x64xf32>
    %178 = math.exp %177 : vector<16x64xf32>
    %cst_86 = arith.constant 1.000000e+00 : f32
    %179 = vector.broadcast %cst_86 : f32 to vector<16x64xf32>
    %180 = arith.addf %179, %178 : vector<16x64xf32>
    %181 = arith.divf %179, %180 : vector<16x64xf32>
    %182 = arith.mulf %175, %181 : vector<16x64xf32>
    %183 = arith.mulf %182, %176 : vector<16x64xf32>
    %c0_87 = arith.constant 0 : index
    %c0_88 = arith.constant 0 : index
    %c0_89 = arith.constant 0 : index
    %184 = vector.load %arg10[%c0_87, %c0_88, %c0_89] : memref<2x64x32xf32, #tpu.memory_space<vmem>>, vector<1x64x32xf32>
    %185 = vector.shape_cast %184 : vector<1x64x32xf32> to vector<64x32xf32>
    %cst_90 = arith.constant dense<0.000000e+00> : vector<16x32xf32>
    %186 = tpu.matmul %183, %185, %cst_90 {dimension_numbers = #tpu.dot_dimension_numbers<[1], [0], [0], [1], [0, 0, 1, 1], [], []>} : vector<16x64xf32>, vector<64x32xf32>, vector<16x32xf32> -> vector<16x32xf32>
    %187 = arith.addf %159, %186 : vector<16x32xf32>
    %c1_91 = arith.constant 1 : index
    %c0_92 = arith.constant 0 : index
    %c0_93 = arith.constant 0 : index
    %188 = vector.load %arg6[%c1_91, %c0_92, %c0_93] : memref<2x2x32xf32, #tpu.memory_space<vmem>>, vector<1x2x32xf32>
    %189 = vector.shape_cast %188 : vector<1x2x32xf32> to vector<2x32xf32>
    %190 = vector.extract_strided_slice %189 {offsets = [0, 0], sizes = [1, 32], strides = [1, 1]} : vector<2x32xf32> to vector<1x32xf32>
    %191 = vector.extract_strided_slice %189 {offsets = [1, 0], sizes = [1, 32], strides = [1, 1]} : vector<2x32xf32> to vector<1x32xf32>
    %192 = arith.mulf %187, %187 : vector<16x32xf32>
    %cst_94 = arith.constant dense<0.000000e+00> : vector<16xf32>
    %193 = vector.multi_reduction <add>, %192, %cst_94 [1] : vector<16x32xf32> to vector<16xf32>
    %194 = vector.shape_cast %193 : vector<16xf32> to vector<16x1xf32>
    %cst_95 = arith.constant 3.200000e+01 : f32
    %195 = vector.broadcast %cst_95 : f32 to vector<16x1xf32>
    %196 = arith.divf %194, %195 : vector<16x1xf32>
    %cst_96 = arith.constant 9.99999974E-6 : f32
    %197 = vector.broadcast %cst_96 : f32 to vector<16x1xf32>
    %198 = arith.addf %196, %197 : vector<16x1xf32>
    %199 = math.rsqrt %198 : vector<16x1xf32>
    %200 = vector.broadcast %199 : vector<16x1xf32> to vector<16x32xf32>
    %201 = arith.mulf %187, %200 : vector<16x32xf32>
    %202 = vector.broadcast %190 : vector<1x32xf32> to vector<16x32xf32>
    %203 = arith.mulf %201, %202 : vector<16x32xf32>
    %c1_97 = arith.constant 1 : index
    %c0_98 = arith.constant 0 : index
    %c0_99 = arith.constant 0 : index
    %204 = vector.load %arg7[%c1_97, %c0_98, %c0_99] : memref<2x32x112xf32, #tpu.memory_space<vmem>>, vector<1x32x112xf32>
    %205 = vector.shape_cast %204 : vector<1x32x112xf32> to vector<32x112xf32>
    %cst_100 = arith.constant dense<0.000000e+00> : vector<16x112xf32>
    %206 = tpu.matmul %203, %205, %cst_100 {dimension_numbers = #tpu.dot_dimension_numbers<[1], [0], [0], [1], [0, 0, 1, 1], [], []>} : vector<16x32xf32>, vector<32x112xf32>, vector<16x112xf32> -> vector<16x112xf32>
    %207 = vector.extract_strided_slice %206 {offsets = [0, 0], sizes = [16, 32], strides = [1, 1]} : vector<16x112xf32> to vector<16x32xf32>
    %208 = arith.mulf %207, %2 : vector<16x32xf32>
    %209 = vector.extract_strided_slice %206 {offsets = [0, 64], sizes = [16, 32], strides = [1, 1]} : vector<16x112xf32> to vector<16x32xf32>
    %210 = arith.mulf %209, %3 : vector<16x32xf32>
    %211 = arith.addf %208, %210 : vector<16x32xf32>
    %212 = vector.extract_strided_slice %206 {offsets = [0, 32], sizes = [16, 16], strides = [1, 1]} : vector<16x112xf32> to vector<16x16xf32>
    %213 = arith.mulf %212, %4 : vector<16x16xf32>
    %214 = vector.extract_strided_slice %206 {offsets = [0, 96], sizes = [16, 16], strides = [1, 1]} : vector<16x112xf32> to vector<16x16xf32>
    %215 = arith.mulf %214, %5 : vector<16x16xf32>
    %216 = arith.addf %213, %215 : vector<16x16xf32>
    %217 = vector.extract_strided_slice %206 {offsets = [0, 48], sizes = [16, 16], strides = [1, 1]} : vector<16x112xf32> to vector<16x16xf32>
    %c1_101 = arith.constant 1 : index
    %c0_102 = arith.constant 0 : index
    %c0_103 = arith.constant 0 : index
    %c0_104 = arith.constant 0 : index
    %218 = vector.load %arg4[%c1_101, %c0_102, %c0_103, %c0_104] : memref<2x2x16x16xf32, #tpu.memory_space<vmem>>, vector<1x1x16x16xf32>
    %219 = vector.shape_cast %218 : vector<1x1x16x16xf32> to vector<16x16xf32>
    %c1_105 = arith.constant 1 : index
    %c1_106 = arith.constant 1 : index
    %c0_107 = arith.constant 0 : index
    %c0_108 = arith.constant 0 : index
    %220 = vector.load %arg4[%c1_105, %c1_106, %c0_107, %c0_108] : memref<2x2x16x16xf32, #tpu.memory_space<vmem>>, vector<1x1x16x16xf32>
    %221 = vector.shape_cast %220 : vector<1x1x16x16xf32> to vector<16x16xf32>
    %c1_109 = arith.constant 1 : index
    %c0_110 = arith.constant 0 : index
    %c0_111 = arith.constant 0 : index
    %c0_112 = arith.constant 0 : index
    %222 = vector.load %arg5[%c1_109, %c0_110, %c0_111, %c0_112] : memref<2x2x16x16xf32, #tpu.memory_space<vmem>>, vector<1x1x16x16xf32>
    %223 = vector.shape_cast %222 : vector<1x1x16x16xf32> to vector<16x16xf32>
    %c1_113 = arith.constant 1 : index
    %c1_114 = arith.constant 1 : index
    %c0_115 = arith.constant 0 : index
    %c0_116 = arith.constant 0 : index
    %224 = vector.load %arg5[%c1_113, %c1_114, %c0_115, %c0_116] : memref<2x2x16x16xf32, #tpu.memory_space<vmem>>, vector<1x1x16x16xf32>
    %225 = vector.shape_cast %224 : vector<1x1x16x16xf32> to vector<16x16xf32>
    %c1_117 = arith.constant 1 : index
    %c0_118 = arith.constant 0 : index
    %c0_119 = arith.constant 0 : index
    %c0_120 = arith.constant 0 : index
    %226 = vector.load %arg14[%c1_117, %c0_118, %c0_119, %c0_120] : memref<2x2x16x16xf32, #tpu.memory_space<vmem>>, vector<1x1x16x16xf32>
    %227 = vector.shape_cast %226 : vector<1x1x16x16xf32> to vector<16x16xf32>
    %228 = vector.shape_cast %219 : vector<16x16xf32> to vector<1x1x16x16xf32>
    tpu.vector_store %arg14[%c1_117, %c0_118, %c0_119, %c0_120], %228 {strides = array<i32>} : memref<2x2x16x16xf32, #tpu.memory_space<vmem>>, vector<1x1x16x16xf32>,
    %c1_121 = arith.constant 1 : index
    %c0_122 = arith.constant 0 : index
    %c0_123 = arith.constant 0 : index
    %c0_124 = arith.constant 0 : index
    %229 = vector.load %arg15[%c1_121, %c0_122, %c0_123, %c0_124] : memref<2x2x16x16xf32, #tpu.memory_space<vmem>>, vector<1x1x16x16xf32>
    %230 = vector.shape_cast %229 : vector<1x1x16x16xf32> to vector<16x16xf32>
    %231 = vector.shape_cast %223 : vector<16x16xf32> to vector<1x1x16x16xf32>
    tpu.vector_store %arg15[%c1_121, %c0_122, %c0_123, %c0_124], %231 {strides = array<i32>} : memref<2x2x16x16xf32, #tpu.memory_space<vmem>>, vector<1x1x16x16xf32>,
    %232 = vector.extract_strided_slice %216 {offsets = [0, 0], sizes = [8, 16], strides = [1, 1]} : vector<16x16xf32> to vector<8x16xf32>
    %c1_125 = arith.constant 1 : index
    %c0_126 = arith.constant 0 : index
    %233 = arith.index_cast %0 : i32 to index
    %c0_127 = arith.constant 0 : index
    %234 = vector.load %arg14[%c1_125, %c0_126, %233, %c0_127] : memref<2x2x16x16xf32, #tpu.memory_space<vmem>>, vector<1x1x8x16xf32>
    %235 = vector.shape_cast %234 : vector<1x1x8x16xf32> to vector<8x16xf32>
    %236 = vector.shape_cast %232 : vector<8x16xf32> to vector<1x1x8x16xf32>
    tpu.vector_store %arg14[%c1_125, %c0_126, %233, %c0_127], %236 {strides = array<i32>} : memref<2x2x16x16xf32, #tpu.memory_space<vmem>>, vector<1x1x8x16xf32>,
    %237 = vector.extract_strided_slice %217 {offsets = [0, 0], sizes = [8, 16], strides = [1, 1]} : vector<16x16xf32> to vector<8x16xf32>
    %c1_128 = arith.constant 1 : index
    %c0_129 = arith.constant 0 : index
    %238 = arith.index_cast %0 : i32 to index
    %c0_130 = arith.constant 0 : index
    %239 = vector.load %arg15[%c1_128, %c0_129, %238, %c0_130] : memref<2x2x16x16xf32, #tpu.memory_space<vmem>>, vector<1x1x8x16xf32>
    %240 = vector.shape_cast %239 : vector<1x1x8x16xf32> to vector<8x16xf32>
    %241 = vector.shape_cast %237 : vector<8x16xf32> to vector<1x1x8x16xf32>
    tpu.vector_store %arg15[%c1_128, %c0_129, %238, %c0_130], %241 {strides = array<i32>} : memref<2x2x16x16xf32, #tpu.memory_space<vmem>>, vector<1x1x8x16xf32>,
    %c1_131 = arith.constant 1 : index
    %c1_132 = arith.constant 1 : index
    %c0_133 = arith.constant 0 : index
    %c0_134 = arith.constant 0 : index
    %242 = vector.load %arg14[%c1_131, %c1_132, %c0_133, %c0_134] : memref<2x2x16x16xf32, #tpu.memory_space<vmem>>, vector<1x1x16x16xf32>
    %243 = vector.shape_cast %242 : vector<1x1x16x16xf32> to vector<16x16xf32>
    %244 = vector.shape_cast %221 : vector<16x16xf32> to vector<1x1x16x16xf32>
    tpu.vector_store %arg14[%c1_131, %c1_132, %c0_133, %c0_134], %244 {strides = array<i32>} : memref<2x2x16x16xf32, #tpu.memory_space<vmem>>, vector<1x1x16x16xf32>,
    %c1_135 = arith.constant 1 : index
    %c1_136 = arith.constant 1 : index
    %c0_137 = arith.constant 0 : index
    %c0_138 = arith.constant 0 : index
    %245 = vector.load %arg15[%c1_135, %c1_136, %c0_137, %c0_138] : memref<2x2x16x16xf32, #tpu.memory_space<vmem>>, vector<1x1x16x16xf32>
    %246 = vector.shape_cast %245 : vector<1x1x16x16xf32> to vector<16x16xf32>
    %247 = vector.shape_cast %225 : vector<16x16xf32> to vector<1x1x16x16xf32>
    tpu.vector_store %arg15[%c1_135, %c1_136, %c0_137, %c0_138], %247 {strides = array<i32>} : memref<2x2x16x16xf32, #tpu.memory_space<vmem>>, vector<1x1x16x16xf32>,
    %248 = vector.extract_strided_slice %216 {offsets = [8, 0], sizes = [8, 16], strides = [1, 1]} : vector<16x16xf32> to vector<8x16xf32>
    %c1_139 = arith.constant 1 : index
    %c1_140 = arith.constant 1 : index
    %249 = arith.index_cast %0 : i32 to index
    %c0_141 = arith.constant 0 : index
    %250 = vector.load %arg14[%c1_139, %c1_140, %249, %c0_141] : memref<2x2x16x16xf32, #tpu.memory_space<vmem>>, vector<1x1x8x16xf32>
    %251 = vector.shape_cast %250 : vector<1x1x8x16xf32> to vector<8x16xf32>
    %252 = vector.shape_cast %248 : vector<8x16xf32> to vector<1x1x8x16xf32>
    tpu.vector_store %arg14[%c1_139, %c1_140, %249, %c0_141], %252 {strides = array<i32>} : memref<2x2x16x16xf32, #tpu.memory_space<vmem>>, vector<1x1x8x16xf32>,
    %253 = vector.extract_strided_slice %217 {offsets = [8, 0], sizes = [8, 16], strides = [1, 1]} : vector<16x16xf32> to vector<8x16xf32>
    %c1_142 = arith.constant 1 : index
    %c1_143 = arith.constant 1 : index
    %254 = arith.index_cast %0 : i32 to index
    %c0_144 = arith.constant 0 : index
    %255 = vector.load %arg15[%c1_142, %c1_143, %254, %c0_144] : memref<2x2x16x16xf32, #tpu.memory_space<vmem>>, vector<1x1x8x16xf32>
    %256 = vector.shape_cast %255 : vector<1x1x8x16xf32> to vector<8x16xf32>
    %257 = vector.shape_cast %253 : vector<8x16xf32> to vector<1x1x8x16xf32>
    tpu.vector_store %arg15[%c1_142, %c1_143, %254, %c0_144], %257 {strides = array<i32>} : memref<2x2x16x16xf32, #tpu.memory_space<vmem>>, vector<1x1x8x16xf32>,
    %258 = tpu.concatenate %219, %221, %216 in 0 : vector<16x16xf32>, vector<16x16xf32>, vector<16x16xf32> -> vector<48x16xf32>
    %259 = tpu.concatenate %223, %225, %217 in 0 : vector<16x16xf32>, vector<16x16xf32>, vector<16x16xf32> -> vector<48x16xf32>
    %260 = vector.extract_strided_slice %211 {offsets = [0, 0], sizes = [16, 8], strides = [1, 1]} : vector<16x32xf32> to vector<16x8xf32>
    %261 = vector.extract_strided_slice %211 {offsets = [0, 8], sizes = [16, 8], strides = [1, 1]} : vector<16x32xf32> to vector<16x8xf32>
    %262 = tpu.concatenate %260, %261 in 0 : vector<16x8xf32>, vector<16x8xf32> -> vector<32x8xf32>
    %263 = vector.extract_strided_slice %258 {offsets = [0, 0], sizes = [48, 8], strides = [1, 1]} : vector<48x16xf32> to vector<48x8xf32>
    %264 = vector.extract_strided_slice %259 {offsets = [0, 0], sizes = [48, 8], strides = [1, 1]} : vector<48x16xf32> to vector<48x8xf32>
    %cst_145 = arith.constant dense<0.000000e+00> : vector<32x48xf32>
    %265 = tpu.matmul %262, %263, %cst_145 {dimension_numbers = #tpu.dot_dimension_numbers<[1], [1], [0], [0], [0, 0, 1, 0], [], []>} : vector<32x8xf32>, vector<48x8xf32>, vector<32x48xf32> -> vector<32x48xf32>
    %cst_146 = arith.constant 0.353553385 : f32
    %266 = vector.broadcast %cst_146 : f32 to vector<32x48xf32>
    %267 = arith.mulf %265, %266 : vector<32x48xf32>
    %268 = arith.addf %267, %38 : vector<32x48xf32>
    %cst_147 = arith.constant dense<0xFF800000> : vector<32xf32>
    %269 = vector.multi_reduction <maximumf>, %268, %cst_147 [1] : vector<32x48xf32> to vector<32xf32>
    %270 = vector.shape_cast %269 : vector<32xf32> to vector<32x1xf32>
    %271 = vector.broadcast %270 : vector<32x1xf32> to vector<32x48xf32>
    %272 = arith.subf %268, %271 : vector<32x48xf32>
    %273 = math.exp %272 : vector<32x48xf32>
    %cst_148 = arith.constant dense<0.000000e+00> : vector<32xf32>
    %274 = vector.multi_reduction <add>, %273, %cst_148 [1] : vector<32x48xf32> to vector<32xf32>
    %275 = vector.shape_cast %274 : vector<32xf32> to vector<32x1xf32>
    %276 = tpu.reciprocal %275 {approx = true} : vector<32x1xf32> -> vector<32x1xf32>
    %277 = vector.broadcast %276 : vector<32x1xf32> to vector<32x48xf32>
    %278 = arith.mulf %273, %277 : vector<32x48xf32>
    %cst_149 = arith.constant dense<0.000000e+00> : vector<32x8xf32>
    %279 = tpu.matmul %278, %264, %cst_149 {dimension_numbers = #tpu.dot_dimension_numbers<[1], [0], [0], [1], [0, 0, 1, 1], [], []>} : vector<32x48xf32>, vector<48x8xf32>, vector<32x8xf32> -> vector<32x8xf32>
    %280 = vector.extract_strided_slice %279 {offsets = [0, 0], sizes = [16, 8], strides = [1, 1]} : vector<32x8xf32> to vector<16x8xf32>
    %281 = vector.extract_strided_slice %279 {offsets = [16, 0], sizes = [16, 8], strides = [1, 1]} : vector<32x8xf32> to vector<16x8xf32>
    %282 = vector.extract_strided_slice %211 {offsets = [0, 16], sizes = [16, 8], strides = [1, 1]} : vector<16x32xf32> to vector<16x8xf32>
    %283 = vector.extract_strided_slice %211 {offsets = [0, 24], sizes = [16, 8], strides = [1, 1]} : vector<16x32xf32> to vector<16x8xf32>
    %284 = tpu.concatenate %282, %283 in 0 : vector<16x8xf32>, vector<16x8xf32> -> vector<32x8xf32>
    %285 = vector.extract_strided_slice %258 {offsets = [0, 8], sizes = [48, 8], strides = [1, 1]} : vector<48x16xf32> to vector<48x8xf32>
    %286 = vector.extract_strided_slice %259 {offsets = [0, 8], sizes = [48, 8], strides = [1, 1]} : vector<48x16xf32> to vector<48x8xf32>
    %cst_150 = arith.constant dense<0.000000e+00> : vector<32x48xf32>
    %287 = tpu.matmul %284, %285, %cst_150 {dimension_numbers = #tpu.dot_dimension_numbers<[1], [1], [0], [0], [0, 0, 1, 0], [], []>} : vector<32x8xf32>, vector<48x8xf32>, vector<32x48xf32> -> vector<32x48xf32>
    %cst_151 = arith.constant 0.353553385 : f32
    %288 = vector.broadcast %cst_151 : f32 to vector<32x48xf32>
    %289 = arith.mulf %287, %288 : vector<32x48xf32>
    %290 = arith.addf %289, %38 : vector<32x48xf32>
    %cst_152 = arith.constant dense<0xFF800000> : vector<32xf32>
    %291 = vector.multi_reduction <maximumf>, %290, %cst_152 [1] : vector<32x48xf32> to vector<32xf32>
    %292 = vector.shape_cast %291 : vector<32xf32> to vector<32x1xf32>
    %293 = vector.broadcast %292 : vector<32x1xf32> to vector<32x48xf32>
    %294 = arith.subf %290, %293 : vector<32x48xf32>
    %295 = math.exp %294 : vector<32x48xf32>
    %cst_153 = arith.constant dense<0.000000e+00> : vector<32xf32>
    %296 = vector.multi_reduction <add>, %295, %cst_153 [1] : vector<32x48xf32> to vector<32xf32>
    %297 = vector.shape_cast %296 : vector<32xf32> to vector<32x1xf32>
    %298 = tpu.reciprocal %297 {approx = true} : vector<32x1xf32> -> vector<32x1xf32>
    %299 = vector.broadcast %298 : vector<32x1xf32> to vector<32x48xf32>
    %300 = arith.mulf %295, %299 : vector<32x48xf32>
    %cst_154 = arith.constant dense<0.000000e+00> : vector<32x8xf32>
    %301 = tpu.matmul %300, %286, %cst_154 {dimension_numbers = #tpu.dot_dimension_numbers<[1], [0], [0], [1], [0, 0, 1, 1], [], []>} : vector<32x48xf32>, vector<48x8xf32>, vector<32x8xf32> -> vector<32x8xf32>
    %302 = vector.extract_strided_slice %301 {offsets = [0, 0], sizes = [16, 8], strides = [1, 1]} : vector<32x8xf32> to vector<16x8xf32>
    %303 = vector.extract_strided_slice %301 {offsets = [16, 0], sizes = [16, 8], strides = [1, 1]} : vector<32x8xf32> to vector<16x8xf32>
    %304 = tpu.concatenate %280, %281, %302, %303 in 1 : vector<16x8xf32>, vector<16x8xf32>, vector<16x8xf32>, vector<16x8xf32> -> vector<16x32xf32>
    %c1_155 = arith.constant 1 : index
    %c0_156 = arith.constant 0 : index
    %c0_157 = arith.constant 0 : index
    %305 = vector.load %arg8[%c1_155, %c0_156, %c0_157] : memref<2x32x32xf32, #tpu.memory_space<vmem>>, vector<1x32x32xf32>
    %306 = vector.shape_cast %305 : vector<1x32x32xf32> to vector<32x32xf32>
    %cst_158 = arith.constant dense<0.000000e+00> : vector<16x32xf32>
    %307 = tpu.matmul %304, %306, %cst_158 {dimension_numbers = #tpu.dot_dimension_numbers<[1], [0], [0], [1], [0, 0, 1, 1], [], []>} : vector<16x32xf32>, vector<32x32xf32>, vector<16x32xf32> -> vector<16x32xf32>
    %308 = arith.addf %187, %307 : vector<16x32xf32>
    %309 = arith.mulf %308, %308 : vector<16x32xf32>
    %cst_159 = arith.constant dense<0.000000e+00> : vector<16xf32>
    %310 = vector.multi_reduction <add>, %309, %cst_159 [1] : vector<16x32xf32> to vector<16xf32>
    %311 = vector.shape_cast %310 : vector<16xf32> to vector<16x1xf32>
    %cst_160 = arith.constant 3.200000e+01 : f32
    %312 = vector.broadcast %cst_160 : f32 to vector<16x1xf32>
    %313 = arith.divf %311, %312 : vector<16x1xf32>
    %cst_161 = arith.constant 9.99999974E-6 : f32
    %314 = vector.broadcast %cst_161 : f32 to vector<16x1xf32>
    %315 = arith.addf %313, %314 : vector<16x1xf32>
    %316 = math.rsqrt %315 : vector<16x1xf32>
    %317 = vector.broadcast %316 : vector<16x1xf32> to vector<16x32xf32>
    %318 = arith.mulf %308, %317 : vector<16x32xf32>
    %319 = vector.broadcast %191 : vector<1x32xf32> to vector<16x32xf32>
    %320 = arith.mulf %318, %319 : vector<16x32xf32>
    %c1_162 = arith.constant 1 : index
    %c0_163 = arith.constant 0 : index
    %c0_164 = arith.constant 0 : index
    %321 = vector.load %arg9[%c1_162, %c0_163, %c0_164] : memref<2x32x128xf32, #tpu.memory_space<vmem>>, vector<1x32x128xf32>
    %322 = vector.shape_cast %321 : vector<1x32x128xf32> to vector<32x128xf32>
    %cst_165 = arith.constant dense<0.000000e+00> : vector<16x128xf32>
    %323 = tpu.matmul %320, %322, %cst_165 {dimension_numbers = #tpu.dot_dimension_numbers<[1], [0], [0], [1], [0, 0, 1, 1], [], []>} : vector<16x32xf32>, vector<32x128xf32>, vector<16x128xf32> -> vector<16x128xf32>
    %324 = vector.extract_strided_slice %323 {offsets = [0, 0], sizes = [16, 64], strides = [1, 1]} : vector<16x128xf32> to vector<16x64xf32>
    %325 = vector.extract_strided_slice %323 {offsets = [0, 64], sizes = [16, 64], strides = [1, 1]} : vector<16x128xf32> to vector<16x64xf32>
    %326 = arith.negf %324 : vector<16x64xf32>
    %327 = math.exp %326 : vector<16x64xf32>
    %cst_166 = arith.constant 1.000000e+00 : f32
    %328 = vector.broadcast %cst_166 : f32 to vector<16x64xf32>
    %329 = arith.addf %328, %327 : vector<16x64xf32>
    %330 = arith.divf %328, %329 : vector<16x64xf32>
    %331 = arith.mulf %324, %330 : vector<16x64xf32>
    %332 = arith.mulf %331, %325 : vector<16x64xf32>
    %c1_167 = arith.constant 1 : index
    %c0_168 = arith.constant 0 : index
    %c0_169 = arith.constant 0 : index
    %333 = vector.load %arg10[%c1_167, %c0_168, %c0_169] : memref<2x64x32xf32, #tpu.memory_space<vmem>>, vector<1x64x32xf32>
    %334 = vector.shape_cast %333 : vector<1x64x32xf32> to vector<64x32xf32>
    %cst_170 = arith.constant dense<0.000000e+00> : vector<16x32xf32>
    %335 = tpu.matmul %332, %334, %cst_170 {dimension_numbers = #tpu.dot_dimension_numbers<[1], [0], [0], [1], [0, 0, 1, 1], [], []>} : vector<16x64xf32>, vector<64x32xf32>, vector<16x32xf32> -> vector<16x32xf32>
    %336 = arith.addf %308, %335 : vector<16x32xf32>
    %c0_171 = arith.constant 0 : index
    %c0_172 = arith.constant 0 : index
    %337 = vector.load %arg11[%c0_171, %c0_172] : memref<1x32xf32, #tpu.memory_space<vmem>>, vector<1x32xf32>
    %338 = arith.mulf %336, %336 : vector<16x32xf32>
    %cst_173 = arith.constant dense<0.000000e+00> : vector<16xf32>
    %339 = vector.multi_reduction <add>, %338, %cst_173 [1] : vector<16x32xf32> to vector<16xf32>
    %340 = vector.shape_cast %339 : vector<16xf32> to vector<16x1xf32>
    %cst_174 = arith.constant 3.200000e+01 : f32
    %341 = vector.broadcast %cst_174 : f32 to vector<16x1xf32>
    %342 = arith.divf %340, %341 : vector<16x1xf32>
    %cst_175 = arith.constant 9.99999974E-6 : f32
    %343 = vector.broadcast %cst_175 : f32 to vector<16x1xf32>
    %344 = arith.addf %342, %343 : vector<16x1xf32>
    %345 = math.rsqrt %344 : vector<16x1xf32>
    %346 = vector.broadcast %345 : vector<16x1xf32> to vector<16x32xf32>
    %347 = arith.mulf %336, %346 : vector<16x32xf32>
    %348 = vector.broadcast %337 : vector<1x32xf32> to vector<16x32xf32>
    %349 = arith.mulf %347, %348 : vector<16x32xf32>
    %c0_176 = arith.constant 0 : index
    %c0_177 = arith.constant 0 : index
    %350 = vector.load %arg12[%c0_176, %c0_177] : memref<32x256xf32, #tpu.memory_space<vmem>>, vector<32x256xf32>
    %cst_178 = arith.constant dense<0.000000e+00> : vector<16x256xf32>
    %351 = tpu.matmul %349, %350, %cst_178 {dimension_numbers = #tpu.dot_dimension_numbers<[1], [0], [0], [1], [0, 0, 1, 1], [], []>} : vector<16x32xf32>, vector<32x256xf32>, vector<16x256xf32> -> vector<16x256xf32>
    %c0_179 = arith.constant 0 : index
    %c0_180 = arith.constant 0 : index
    %352 = vector.load %arg13[%c0_179, %c0_180] : memref<16x256xf32, #tpu.memory_space<vmem>>, vector<16x256xf32>
    tpu.vector_store %arg13[%c0_179, %c0_180], %351 {strides = array<i32>} : memref<16x256xf32, #tpu.memory_space<vmem>>, vector<16x256xf32>,
    return
  }
}

</mosaic_0001>

<bundles_post_ra>
// kernel: toy_model_forward.1
= control target key start
LH: loop header
LB: loop body
LE: loop exit
PB: predicated region body
PF: predicated region fallthrough
CT: control target
= control target key end

     0   :  { %21 = vsyncpa [#allocation3], 0  ;;  %s4352_s0 = inlined_call_operand.vmem [shape: s32[8], index: 0, kind: input, shape index: {}]   ;;  %s4353_s1 = inlined_call_operand.vmem [shape: f32[16,32], index: 1, kind: input, shape index: {}]   ;;  %s4354_s2 = inlined_call_operand.vmem [shape: f32[16,32], index: 2, kind: input, shape index: {}]   ;;  %s4355_s3 = inlined_call_operand.vmem [shape: f32[16,32], index: 3, kind: input, shape index: {}]   ;;  %s4356_s4 = inlined_call_operand.vmem [shape: f32[2,2,16,16], index: 4, kind: input, shape index: {}, may-alias: {4,14}]   ;;  %s4357_s5 = inlined_call_operand.vmem [shape: f32[2,2,16,16], index: 5, kind: input, shape index: {}, may-alias: {5,15}]   ;;  %s4358_s6 = inlined_call_operand.vmem [shape: f32[2,2,32], index: 6, kind: input, shape index: {}]   ;;  %s4359_s7 = inlined_call_operand.vmem [shape: f32[2,32,112], index: 7, kind: input, shape index: {}]   ;;  %s4360_s8 = inlined_call_operand.vmem [shape: f32[2,32,32], index: 8, kind: input, shape index: {}]   ;;  %s4361_s9 = inlined_call_operand.vmem [shape: f32[2,32,128], index: 9, kind: input, shape index: {}]   ;;  %s4362_s10 = inlined_call_operand.vmem [shape: f32[2,64,32], index: 10, kind: input, shape index: {}]   ;;  %s4363_s11 = inlined_call_operand.vmem [shape: f32[1,32], index: 11, kind: input, shape index: {}]   ;;  %s4364_s12 = inlined_call_operand.vmem [shape: f32[32,256], index: 12, kind: input, shape index: {}]   ;;  %s4365_s13 = inlined_call_operand.vmem [shape: f32[16,256], index: 13, kind: output, shape index: {0}]   ;;  %s4366_s14 = inlined_call_operand.vmem [shape: f32[2,2,16,16], index: 14, kind: output, shape index: {1}, may-alias: {4,14}]   ;;  %s4367_s15 = inlined_call_operand.vmem [shape: f32[2,2,16,16], index: 15, kind: output, shape index: {2}, may-alias: {5,15}]  }
   0x1   :  { %s28_s20 = sshll.u32 %s4352_s0, 4  ;;  %s29_s20 = int_to_ptr.vmem [resolvable:$true] %s28_s20 }
   0x2   :  { %s3348_s21 = scalar_lea.vmem %s29_s20, 16  ;;  %p3353_p1 = scmp.lt.s32.totalorder %s29_s20, %s29_s20 }
   0x3   :  { %p3349_p0 = scmp.ne.s32.totalorder %s29_s20, %s3348_s21  ;;  %p3354_p2 = scmp.lt.s32.totalorder %s3348_s21, %s3348_s21 }
   0x5   :  { %p3355_p3 = por %p3354_p2, %p3353_p1 }
   0x7   :  { %p3356_p4 = pnand %p3355_p3, %p3349_p0 }
   0x9   :  { %3359 = shalt.err (!%p3356_p4)
}
   0xa   :  { %s3362_s22 = smov [#allocation2]  }
   0xb   :  { %31 = dma.vmem_to_smem %s29_s20, 16, %s3362_s22, [#allocation3]  }
   0xc   :  { %3360 = dma.done.wait [#allocation3], 16  }
   0xd   :  { %3361 = vsyncadd [#allocation3], 4294967280 }
   0xe   :  { %59 = sfence }
   0xf   :  { %v3460_v0 = vld [vmem:[%s4353_s1] sm:$0xff]  ;;  %vm104_vm0 = vcmask 261120   ;;  %v3465_v1 = vld [vmem:[%s4353_s1 + $0x8] sm:$0xff]  ;;  %v133_v8 = vld [vmem:[%s4359_s7 + $0x10] sm:$0xff]  ;;  %s3363_s20 = smov 96   ;;  %s3364_s21 = smov 64   ;;  %v67_v18 = vlaneseq }
  0x10   :  { %v108_v2 = vmul.f32 %v3460_v0, %v3460_v0  ;;  %v109_v3 = vmul.f32 %v3465_v1, %v3465_v1  ;;  %v131_v6 = vld [vmem:[%s4359_s7] sm:$0xff]  ;;  %v132_v7 = vld [vmem:[%s4359_s7 + $0x8] sm:$0xff]  ;;  %v134_v10 = vld [vmem:[%s4359_s7 + $0x18] sm:$0xff]  ;;  %s3365_s25 = smov 32   ;;  %vm318_vm1 = vcmask 64512   ;;  %vm276_vm3 = vcmask 130048  }
  0x11   :  { %v2966_v9 = vpack.c.bf16 %v132_v7, %v131_v6  ;;  %v2970_v11 = vpack.c.bf16 %v134_v10, %v133_v8  ;;  %v65_v12 = vld [vmem:[%s4355_s3] sm:$0xff]  ;;  %v66_v13 = vld [vmem:[%s4355_s3 + $0x8] sm:$0xff]  ;;  %v3506_v22 = vshrl.u32 %v67_v18, 7  ;;  %vm3547_vm2 = vmpackc.low %vm318_vm1, %vm318_vm1  ;;  %v71_v63 = vand.u32 127, %v67_v18  ;;  %s3366_s27 = smov 120   ;;  %s3621_s3 = sld [smem:[#allocation2]] }
  0x12   :  { %v110_v4 = vsel %vm104_vm0, %v108_v2, 0.0  ;;  %v113_v5 = vsel %vm104_vm0, %v109_v3, 0.0  ;;  %248 = vrot.lane.b32.xlu1 %v65_v12, %s3363_s20  ;;  %v3498_v14 = vld [vmem:[%s4354_s2] sm:$0xff]  ;;  %v64_v15 = vld [vmem:[%s4354_s2 + $0x8] sm:$0xff]  ;;  %v3557_v44 = vld [vmem:[%s4356_s4 + $0x10] sm:$0xff]  ;;  %vm436_vm15 = vcmask 392192  }
  0x13   :  { %111 = vadd.xlane.f32.xlu0 %v110_v4  ;;  %2967 = vmatprep.subr.bf16.mxu0 %v2966_v9  ;;  %v127_v24 = vsub.s32 0, %v3506_v22  ;;  %v3512_v25 = vld [vmem:[%s4358_s6] sm:$0x3]  ;;  %v3543_v41 = vld [vmem:[%s4356_s4 + $0x8] sm:$0xff]  ;;  %v3562_v45 = vld [vmem:[%s4356_s4 + $0x18] sm:$0xff]  ;;  %v69_v62 = vadd.s32 8, %v3506_v22 }
  0x14   :  { %2969 = vmatpush3.bf16.msra.mxu0 %v2966_v9  ;;  %v3538_v40 = vld [vmem:[%s4356_s4] sm:$0xff]  ;;  %v2980_v46 = vpack.c.bf16 %v3562_v45, %v3557_v44  ;;  %v72_v2 = vshra.s32 %v3506_v22, 3  ;;  %v82_v7 = vshra.s32 %v71_v63, 3  ;;  %v85_v8 = vand.u32 7, %v71_v63  ;;  %s3368_s28 = smov 80   ;;  %s3370_s17 = smov 8  }
  0x15   :  { %2971 = vmatprep.subr.bf16.mxu0 %v2970_v11  ;;  %v128_v26 = vrot.slane %v3512_v25, %v127_v24  ;;  %v2974_v43 = vpack.c.bf16 %v3543_v41, %v3538_v40  ;;  %277 = vst.msk [vmem:[%s4366_s14] sm:$0xff] %vm276_vm3, %v3538_v40  ;;  %278 = vst.msk [vmem:[%s4366_s14 + $0x8] sm:$0xff] %vm276_vm3, %v3543_v41  ;;  %v73_v6 = vshra.s32 %v69_v62, 3  ;;  %v87_v9 = vand.u32 7, %v69_v62  ;;  %s3371_s19 = smov 16   ;;  %s3372_s22 = smov 24  }
  0x16   :  { %250 = vrot.lane.b32.xlu1 %v66_v13, %s3363_s20  ;;  %vm83_vm6 = vcmp.eq.s32.totalorder %v72_v2, %v82_v7  ;;  %v3367_v10 = vmov -1e+30  }
  0x17   :  { %114 = vadd.xlane.f32.xlu0 %v113_v5  ;;  %2976 = vmatprep.subr.msk.bf16.mxu1 %vm3547_vm2, %v2974_v43  ;;  %v86_v5 = vand.u32 7, %v3506_v22  ;;  %vm84_vm4 = vcmp.eq.s32.totalorder %v73_v6, %v82_v7  ;;  %vm89_vm5 = vcmp.le.s32.totalorder %v85_v8, %v87_v9  ;;  %s3627_s1 = scalar_lea.vmem %s4366_s14, %s3621_s3  ;;  %s3753_s16 = scalar_lea.vmem %s4367_s15, %s3621_s3 }
  0x18   :  { %2973 = vmatpush3.bf16.msra.mxu0 %v2970_v11  ;;  %2979 = vmatpush3.bf16.xpose.msk.msra.mxu1 %vm3547_vm2, %v2974_v43  ;;  %vm91_vm8 = vmand %vm84_vm4, %vm89_vm5  ;;  %vm902_vm4 = vcmask 195584   ;;  %vm1131_vm5 = vcmask 523264  }
  0x19   :  { %2982 = vmatprep.subr.msk.bf16.mxu1 %vm3547_vm2, %v2980_v46  ;;  %vm88_vm7 = vcmp.le.s32.totalorder %v85_v8, %v86_v5  ;;  %v95_v11 = vsel %vm91_vm8, 0.0, %v3367_v10  ;;  %v3719_v5 = vld [vmem:[%s4357_s5 + $0x8] sm:$0xff] }
  0x1a   :  { %222 = vrot.lane.b32.xlu1 %v66_v13, %s3364_s21  ;;  %vm90_vm9 = vmand %vm83_vm6, %vm88_vm7 }
  0x1e   :  { %240 = vrot.lane.b32.xlu1 %v3498_v14, %s3365_s25 }
  0x20   :  { %2985 = vmatpush3.bf16.xpose.msk.msra.mxu1 %vm3547_vm2, %v2980_v46 }
  0x22   :  { %242 = vrot.lane.b32.xlu1 %v64_v15, %s3365_s25 }
  0x2d   :  { %220 = vrot.lane.b32.xlu0 %v65_v12, %s3364_s21  ;;  %v94_v12 = vsel %vm90_vm9, 0.0, %v3367_v10 }
  0x84   :  { %v3521_v33 = vpop.permute.xlu1 %248 }
  0x88   :  { %v3523_v34 = vpop.permute.xlu1 %250 }
  0x8c   :  { %v3525_v35 = vpop.permute.xlu1 %222 }
  0x90   :  { %v3593_v50 = vpop.permute.xlu1 %240 }
  0x94   :  { %v3595_v51 = vpop.permute.xlu1 %242 }
  0xa0   :  { %v112_v16 = vpop.xlane.xlu0 %111 }
  0xa1   :  { %v117_v17 = vmul.f32 0.03125, %v112_v16 }
  0xa3   :  { %v119_v19 = vadd.f32 1e-05, %v117_v17 }
  0xa4   :  { %v115_v20 = vpop.xlane.xlu0 %114 }
  0xa5   :  { %3246 = vrsqrt.f32 %v119_v19  ;;  %v118_v21 = vmul.f32 0.03125, %v115_v20 }
  0xa7   :  { %v120_v23 = vadd.f32 1e-05, %v118_v21 }
  0xa8   :  { %v3583_v48 = vpop.permute.xlu0 %220 }
  0xa9   :  { %3248 = vrsqrt.f32 %v120_v23 }
  0xaf   :  { %v3247_v27 = vpop.eup %3246 }
  0xb0   :  { %v123_v28 = vmul.f32 %v3247_v27, %v3460_v0  ;;  %v77_v27 = vand.u32 15, %v71_v63 }
  0xb2   :  { %v129_v29 = vmul.f32 %v128_v26, %v123_v28  ;;  %v78_v28 = vstv %s3621_s3 }
  0xb3   :  { %v3249_v30 = vpop.eup %3248  ;;  %vm79_vm11 = vcmp.lt.s32.totalorder %v77_v27, %v78_v28 }
  0xb4   :  { %v124_v31 = vmul.f32 %v3249_v30, %v3465_v1  ;;  %2726 = vmatprep.mubr.msk.f32.mxu0 %vm104_vm0, %v129_v29 }
  0xb6   :  { %v130_v32 = vmul.f32 %v128_v26, %v124_v31  ;;  %v74_v26 = vshra.s32 %v71_v63, 4 }
  0xb8   :  { %2727 = vmatmul.mubr.msk.f32.vlgmr.msra.gmra.mrb[0].mxu0 %vm104_vm0, %v130_v32  ;;  %vm76_vm10 = vcmp.eq.s32.totalorder %v73_v6, %v74_v26  ;;  %vm75_vm12 = vcmp.eq.s32.totalorder %v72_v2, %v74_v26  ;;  %v3714_v2 = vld [vmem:[%s4357_s5] sm:$0xff] }
  0xb9   :  { %vm81_vm13 = vmand %vm76_vm10, %vm79_vm11  ;;  %279 = vst.msk [vmem:[%s4367_s15] sm:$0xff] %vm276_vm3, %v3714_v2  ;;  %v2992_v6 = vpack.c.bf16 %v3719_v5, %v3714_v2 }
  0xba   :  { %vm80_vm14 = vmand %vm75_vm12, %vm79_vm11  ;;  %v93_v30 = vsel %vm81_vm13, 0.0, %v3367_v10  ;;  %280 = vst.msk [vmem:[%s4367_s15 + $0x8] sm:$0xff] %vm276_vm3, %v3719_v5 }
  0xbb   :  { %v92_v32 = vsel %vm80_vm14, 0.0, %v3367_v10  ;;  %2993 = vmatprep.subr.bf16.mxu0 %v2992_v6 }
  0xbc   :  { %2995 = vmatpush3.bf16.msra.mxu0 %v2992_v6 }
  0xc1   :  { %v3736_v7 = vld [vmem:[%s4357_s5 + $0x10] sm:$0xff]  ;;  %v3741_v8 = vld [vmem:[%s4357_s5 + $0x18] sm:$0xff] }
  0xc2   :  { %v2996_v9 = vpack.c.bf16 %v3741_v8, %v3736_v7 }
  0xc4   :  { %2997 = vmatprep.subr.bf16.mxu0 %v2996_v9 }
  0xc5   :  { %2999 = vmatpush3.bf16.msra.mxu0 %v2996_v9 }
 0x18b   :  { %v3527_v36 = vpop.f32.mrb[0].mxu0 }
 0x18c   :  { %v3529_v37 = vpop.f32.mrb[1].mxu0  ;;  %v227_v38 = vmul.f32 %v3527_v36, %v3525_v35  ;;  %v255_v47 = vmul.f32 %v3527_v36, %v3523_v34  ;;  %v247_v55 = vmul.f32 %v3527_v36, %v3595_v51  ;;  %v217_v59 = vmul.f32 %v3527_v36, %v64_v15 }
 0x18d   :  { %v254_v39 = vmul.f32 %v3521_v33, %v3529_v37  ;;  %v226_v49 = vmul.f32 %v3583_v48, %v3529_v37  ;;  %v246_v52 = vmul.f32 %v3593_v50, %v3529_v37  ;;  %v216_v60 = vmul.f32 %v3529_v37, %v3498_v14 }
 0x18e   :  { %232 = vrot.lane.b32.xlu0 %v227_v38, %s3364_s21 }
 0x18f   :  { %258 = vrot.lane.b32.xlu1 %v254_v39, %s3364_s21 }
 0x193   :  { %260 = vrot.lane.b32.xlu1 %v255_v47, %s3364_s21 }
 0x197   :  { %230 = vrot.lane.b32.xlu1 %v226_v49, %s3364_s21 }
 0x200   :  { %v233_v58 = vpop.permute.xlu0 %232 }
 0x201   :  { %v259_v53 = vpop.permute.xlu1 %258  ;;  %v3608_v3 = vadd.f32 %v233_v58, %v217_v59 }
 0x202   :  { %v264_v54 = vadd.f32 %v259_v53, %v246_v52 }
 0x204   :  { %282 = vrot.lane.b32.xlu1 %v264_v54, %s3363_s20 }
 0x205   :  { %v261_v56 = vpop.permute.xlu1 %260 }
 0x206   :  { %v265_v57 = vadd.f32 %v261_v56, %v247_v55 }
 0x208   :  { %300 = vrot.lane.b32.xlu0 %v265_v57, %s3363_s20 }
 0x209   :  { %v231_v61 = vpop.permute.xlu1 %230 }
 0x20a   :  { %v3610_v4 = vadd.f32 %v231_v61, %v216_v60 }
 0x20c   :  { %314 = vrot.lane.b32.xlu1 %v3610_v4, %s3366_s27  ;;  %2741 = vmatprep.mubr.msk.f32.mxu1 %vm318_vm1, %v3610_v4 }
 0x20d   :  { %316 = vrot.lane.b32.xlu0 %v3608_v3, %s3366_s27 }
 0x210   :  { %98 = vrot.lane.b32.xlu1 %v94_v12, %s3365_s25 }
 0x211   :  { %100 = vrot.lane.b32.xlu0 %v95_v11, %s3365_s25  ;;  %s3369_s25 = smov 112  }
 0x276   :  { %v3629_v13 = vpop.permute.xlu1 %282 }
 0x277   :  { %286 = vst.msk [vmem:[%s3627_s1] sm:$0xff] %vm276_vm3, %v3629_v13 }
 0x278   :  { %2458 = vst.msk [vmem:[%s4366_s14 + $0x10] sm:$0xff] %vm276_vm3, %v3557_v44  ;;  %2459 = vst.msk [vmem:[%s4366_s14 + $0x18] sm:$0xff] %vm276_vm3, %v3562_v45 }
 0x27a   :  { %v3644_v14 = vpop.permute.xlu0 %300 }
 0x27b   :  { %v2986_v15 = vpack.c.bf16 %v3644_v14, %v3629_v13  ;;  %v3196_v16 = vpack.i.bf16 %v3644_v14, %v3629_v13  ;;  %2462 = vst.msk [vmem:[%s3627_s1 + $0x10] sm:$0xff] %vm276_vm3, %v3644_v14 }
 0x27d   :  { %2988 = vmatprep.subr.msk.bf16.mxu1 %vm3547_vm2, %v2986_v15 }
 0x27e   :  { %2991 = vmatpush3.bf16.xpose.msk.msra.mxu1 %vm3547_vm2, %v2986_v15  ;;  %v3683_v21 = vpop.permute.xlu1 %314 }
 0x27f   :  { %v3689_v23 = vpop.permute.xlu0 %316 }
 0x282   :  { %v3660_v17 = vld [vmem:[%s4356_s4 + $0x20] sm:$0xff]  ;;  %v3665_v18 = vld [vmem:[%s4356_s4 + $0x28] sm:$0xff]  ;;  %v99_v31 = vpop.permute.xlu1 %98 }
 0x283   :  { %2515 = vst.msk [vmem:[%s4366_s14 + $0x20] sm:$0xff] %vm276_vm3, %v3660_v17  ;;  %2516 = vst.msk [vmem:[%s4366_s14 + $0x28] sm:$0xff] %vm276_vm3, %v3665_v18  ;;  %v3679_v19 = vpack.c.bf16 %v3665_v18, %v3660_v17  ;;  %v3216_v20 = vpack.i.bf16 %v3665_v18, %v3660_v17  ;;  %v101_v29 = vpop.permute.xlu0 %100  ;;  %v3698_v47 = vsel %vm104_vm0, %v92_v32, %v99_v31 }
 0x284   :  { %v3695_v39 = vsel %vm104_vm0, %v93_v30, %v101_v29 }
 0x285   :  { %2742 = vmatmul.mubr.msk.f32.vlgmr.msra.gmra.mrb[0].mxu1 %vm318_vm1, %v3608_v3 }
 0x286   :  { %2744 = vmatprep.mubr.msk.f32.mxu1 %vm318_vm1, %v3683_v21 }
 0x289   :  { %2745 = vmatmul.mubr.msk.f32.gmra.mrb[2].mxu1 %vm318_vm1, %v3689_v23 }
 0x358   :  { %v2743_v38 = vpop.f32.mrb[0].mxu1 }
 0x359   :  { %v429_v43 = vmul.f32 0.35355338, %v2743_v38  ;;  %v409_v46 = vpop.f32.mrb[1].mxu1 }
 0x35a   :  { %v428_v49 = vmul.f32 0.35355338, %v409_v46 }
 0x35b   :  { %v433_v52 = vadd.f32 %v429_v43, %v3695_v39 }
 0x35c   :  { %v2746_v53 = vpop.f32.mrb[2].mxu1  ;;  %v432_v54 = vadd.f32 %v428_v49, %v3698_v47 }
 0x35d   :  { %v431_v55 = vmul.f32 0.35355338, %v2746_v53  ;;  %v419_v56 = vpop.f32.mrb[3].mxu1  ;;  %v440_v57 = vsel %vm436_vm15, %v433_v52, -inf }
 0x35e   :  { %v430_v58 = vmul.f32 0.35355338, %v419_v56  ;;  %441 = vmax.xlane.f32.xlu0 %v440_v57  ;;  %v437_v59 = vsel %vm436_vm15, %v432_v54, -inf }
 0x35f   :  { %438 = vmax.xlane.f32.xlu1 %v437_v59  ;;  %v435_v60 = vadd.f32 %v431_v55, %v3695_v39  ;;  %v3186_v55 = vpack.i.bf16 %v3543_v41, %v3538_v40 }
 0x360   :  { %v3706_v61 = vadd.f32 %v430_v58, %v3698_v47 }
 0x361   :  { %v446_v62 = vsel %vm436_vm15, %v435_v60, -inf }
 0x362   :  { %v443_v63 = vsel %vm436_vm15, %v3706_v61, -inf }
 0x363   :  { %444 = vmax.xlane.f32.xlu0 %v443_v63  ;;  %447 = vmax.xlane.f32.xlu1 %v446_v62 }
 0x374   :  { %307 = vrot.lane.b32.xlu1 %v3527_v36, %s3368_s28 }
 0x379   :  { %288 = vrot.lane.b32.xlu0 %v3529_v37, %s3368_s28 }
 0x3eb   :  { %v442_v10 = vpop.xlane.xlu0 %441 }
 0x3ec   :  { %v450_v11 = vsub.f32 %v433_v52, %v442_v10  ;;  %v439_v12 = vpop.xlane.xlu1 %438 }
 0x3ed   :  { %v449_v15 = vsub.f32 %v432_v54, %v439_v12  ;;  %v3191_v54 = vpack.i.bf16 %v3562_v45, %v3557_v44 }
 0x3ee   :  { %v455_v26 = vmul.f32 1.442695, %v450_v11 }
 0x3ef   :  { %v453_v27 = vmul.f32 1.442695, %v449_v15 }
 0x3f0   :  { %3250 = vpow2.f32 %v455_v26  ;;  %v445_v28 = vpop.xlane.xlu0 %444  ;;  %v448_v29 = vpop.xlane.xlu1 %447 }
 0x3f1   :  { %3252 = vpow2.f32 %v453_v27  ;;  %v452_v56 = vsub.f32 %v435_v60, %v448_v29  ;;  %v451_v44 = vsub.f32 %v3706_v61, %v445_v28 }
 0x3f3   :  { %v459_v57 = vmul.f32 1.442695, %v452_v56  ;;  %v457_v45 = vmul.f32 1.442695, %v451_v44 }
 0x3f4   :  { %v3755_v36 = vpop.permute.xlu0 %288  ;;  %v3757_v37 = vpop.permute.xlu1 %307 }
 0x3f5   :  { %292 = vst.msk [vmem:[%s3753_s16] sm:$0xff] %vm276_vm3, %v3755_v36  ;;  %v3000_v30 = vpack.c.bf16 %v3757_v37, %v3755_v36  ;;  %3254 = vpow2.f32 %v459_v57 }
 0x3f6   :  { %2460 = vst.msk [vmem:[%s4367_s15 + $0x10] sm:$0xff] %vm276_vm3, %v3736_v7  ;;  %2461 = vst.msk [vmem:[%s4367_s15 + $0x18] sm:$0xff] %vm276_vm3, %v3741_v8  ;;  %3256 = vpow2.f32 %v457_v45 }
 0x3f7   :  { %2463 = vst.msk [vmem:[%s3753_s16 + $0x10] sm:$0xff] %vm276_vm3, %v3757_v37  ;;  %3001 = vmatprep.subr.bf16.mxu0 %v3000_v30 }
 0x3f8   :  { %3003 = vmatpush3.bf16.msra.mxu0 %v3000_v30 }
 0x3fa   :  { %v3251_v31 = vpop.eup %3250 }
 0x3fb   :  { %v3253_v32 = vpop.eup %3252  ;;  %v464_v38 = vsel %vm436_vm15, %v3251_v31, 0.0 }
 0x3fc   :  { %465 = vadd.xlane.f32.xlu1 %v464_v38  ;;  %v461_v43 = vsel %vm436_vm15, %v3253_v32, 0.0 }
 0x3fd   :  { %462 = vadd.xlane.f32.xlu0 %v461_v43 }
 0x3fe   :  { %v3782_v46 = vld [vmem:[%s4357_s5 + $0x20] sm:$0xff]  ;;  %v3787_v49 = vld [vmem:[%s4357_s5 + $0x28] sm:$0xff] }
 0x3ff   :  { %2517 = vst.msk [vmem:[%s4367_s15 + $0x20] sm:$0xff] %vm276_vm3, %v3782_v46  ;;  %2518 = vst.msk [vmem:[%s4367_s15 + $0x28] sm:$0xff] %vm276_vm3, %v3787_v49  ;;  %v3801_v52 = vpack.c.bf16 %v3787_v49, %v3782_v46  ;;  %v3231_v53 = vpack.i.bf16 %v3787_v49, %v3782_v46  ;;  %v3255_v58 = vpop.eup %3254 }
 0x400   :  { %v470_v40 = vsel %vm436_vm15, %v3255_v58, 0.0  ;;  %v3257_v41 = vpop.eup %3256 }
 0x401   :  { %v467_v13 = vsel %vm436_vm15, %v3257_v41, 0.0 }
 0x40d   :  { %3192 = vrot.lane.b32.xlu1 %v3191_v54, %s3366_s27 }
 0x411   :  { %3197 = vrot.lane.b32.xlu1 %v3196_v16, %s3366_s27 }
 0x413   :  { %3187 = vrot.lane.b32.xlu0 %v3186_v55, %s3366_s27 }
 0x415   :  { %580 = vrot.lane.b32.xlu1 %v3608_v3, %s3369_s25 }
 0x432   :  { %471 = vadd.xlane.f32.xlu0 %v470_v40 }
 0x439   :  { %468 = vadd.xlane.f32.xlu1 %v467_v13 }
 0x448   :  { %578 = vrot.lane.b32.xlu0 %v3610_v4, %s3369_s25 }
 0x44a   :  { %584 = vrot.lane.b32.xlu1 %v3689_v23, %s3369_s25 }
 0x44c   :  { %582 = vrot.lane.b32.xlu0 %v3683_v21, %s3369_s25 }
 0x489   :  { %v466_v3 = vpop.xlane.xlu1 %465 }
 0x48a   :  { %3258 = vrcp.f32 %v466_v3  ;;  %v463_v14 = vpop.xlane.xlu0 %462 }
 0x48b   :  { %3260 = vrcp.f32 %v463_v14 }
 0x48d   :  { %v3193_v62 = vpop.permute.xlu1 %3192 }
 0x48e   :  { %v3188_v16 = vpop.permute.xlu0 %3187  ;;  %v3195_v6 = vunpack.i.h.bf16 %v3193_v62  ;;  %v3194_v9 = vunpack.i.l.bf16 %v3193_v62 }
 0x48f   :  { %v3190_v59 = vunpack.i.h.bf16 %v3188_v16  ;;  %v3189_v60 = vunpack.i.l.bf16 %v3188_v16 }
 0x490   :  { %v3010_v21 = vpack.c.bf16 %v3195_v6, %v3194_v9 }
 0x491   :  { %v3004_v61 = vpack.c.bf16 %v3190_v59, %v3189_v60  ;;  %v3198_v11 = vpop.permute.xlu1 %3197 }
 0x492   :  { %v3200_v12 = vunpack.i.h.bf16 %v3198_v11  ;;  %v3199_v15 = vunpack.i.l.bf16 %v3198_v11 }
 0x493   :  { %3006 = vmatprep.subr.msk.bf16.mxu0 %vm3547_vm2, %v3004_v61 }
 0x494   :  { %v3259_v63 = vpop.eup %3258  ;;  %v3016_v26 = vpack.c.bf16 %v3200_v12, %v3199_v15 }
 0x495   :  { %v3261_v4 = vpop.eup %3260  ;;  %v478_v10 = vmul.f32 %v3259_v63, %v3251_v31  ;;  %v581_v27 = vpop.permute.xlu1 %580 }
 0x496   :  { %v477_v23 = vmul.f32 %v3261_v4, %v3253_v32 }
 0x498   :  { %2759 = vmatprep.mubr.msk.f32.mxu0 %vm436_vm15, %v477_v23 }
 0x499   :  { %2760 = vmatmul.mubr.msk.f32.vlgmr.msra.gmra.mrb[2].mxu0 %vm436_vm15, %v478_v10  ;;  %v3201_v10 = vpack.i.bf16 %v3719_v5, %v3714_v2 }
 0x49a   :  { %3009 = vmatpush3.bf16.xpose.msk.msra.mxu0 %vm3547_vm2, %v3004_v61 }
 0x49b   :  { %3012 = vmatprep.subr.msk.bf16.mxu0 %vm3547_vm2, %v3010_v21 }
 0x4a2   :  { %3015 = vmatpush3.bf16.xpose.msk.msra.mxu0 %vm3547_vm2, %v3010_v21 }
 0x4a3   :  { %3018 = vmatprep.subr.msk.bf16.mxu0 %vm3547_vm2, %v3016_v26 }
 0x4aa   :  { %3021 = vmatpush3.bf16.xpose.msk.msra.mxu0 %vm3547_vm2, %v3016_v26 }
 0x4bf   :  { %v472_v28 = vpop.xlane.xlu0 %471 }
 0x4c0   :  { %3262 = vrcp.f32 %v472_v28 }
 0x4c3   :  { %v579_v38 = vpop.permute.xlu0 %578 }
 0x4c6   :  { %v469_v29 = vpop.xlane.xlu1 %468 }
 0x4c7   :  { %3264 = vrcp.f32 %v469_v29  ;;  %v583_v54 = vpop.permute.xlu0 %582 }
 0x4ca   :  { %v3263_v30 = vpop.eup %3262  ;;  %v585_v55 = vpop.permute.xlu1 %584 }
 0x4cb   :  { %v480_v43 = vmul.f32 %v3263_v30, %v3255_v58 }
 0x4d1   :  { %v3265_v31 = vpop.eup %3264 }
 0x4d2   :  { %v479_v32 = vmul.f32 %v3265_v31, %v3257_v41 }
 0x4d4   :  { %2762 = vmatprep.mubr.msk.f32.mxu0 %vm436_vm15, %v479_v32 }
 0x4d5   :  { %2763 = vmatmul.mubr.msk.f32.gmra.mrb[4].mxu0 %vm436_vm15, %v480_v43 }
 0x4d6   :  { %2777 = vmatprep.mubr.msk.f32.mxu0 %vm318_vm1, %v579_v38 }
 0x4d9   :  { %2778 = vmatmul.mubr.msk.f32.vlgmr.msra.gmra.mrb[6].mxu0 %vm318_vm1, %v581_v27 }
 0x4da   :  { %2780 = vmatprep.mubr.msk.f32.mxu0 %vm318_vm1, %v583_v54 }
 0x4dd   :  { %2781 = vmatmul.mubr.msk.f32.gmra.mrb[8].mxu0 %vm318_vm1, %v585_v55 }
 0x56c   :  { %v3846_v56 = vpop.f32.mrb[2].mxu0 }
 0x56d   :  { %v3848_v57 = vpop.f32.mrb[3].mxu0 }
 0x5a8   :  { %v3850_v44 = vpop.f32.mrb[4].mxu0 }
 0x5a9   :  { %v569_v45 = vpop.f32.mrb[5].mxu0 }
 0x5ac   :  { %v2779_v58 = vpop.f32.mrb[6].mxu0 }
 0x5ad   :  { %v704_v40 = vmul.f32 0.35355338, %v2779_v58  ;;  %v684_v41 = vpop.f32.mrb[7].mxu0 }
 0x5ae   :  { %v703_v13 = vmul.f32 0.35355338, %v684_v41 }
 0x5af   :  { %v708_v3 = vadd.f32 %v704_v40, %v3695_v39 }
 0x5b0   :  { %v2782_v14 = vpop.f32.mrb[8].mxu0  ;;  %v707_v16 = vadd.f32 %v703_v13, %v3698_v47 }
 0x5b1   :  { %v694_v59 = vpop.f32.mrb[9].mxu0  ;;  %v714_v60 = vsel %vm436_vm15, %v708_v3, -inf  ;;  %v706_v61 = vmul.f32 0.35355338, %v2782_v14 }
 0x5b2   :  { %v705_v62 = vmul.f32 0.35355338, %v694_v59  ;;  %715 = vmax.xlane.f32.xlu1 %v714_v60  ;;  %v711_v63 = vsel %vm436_vm15, %v707_v16, -inf  ;;  %v3211_v59 = vpack.i.bf16 %v3757_v37, %v3755_v36  ;;  %v3206_v60 = vpack.i.bf16 %v3741_v8, %v3736_v7 }
 0x5b3   :  { %712 = vmax.xlane.f32.xlu0 %v711_v63  ;;  %v710_v9 = vadd.f32 %v706_v61, %v3695_v39 }
 0x5b4   :  { %v709_v4 = vadd.f32 %v705_v62, %v3698_v47 }
 0x5b5   :  { %v720_v23 = vsel %vm436_vm15, %v710_v9, -inf }
 0x5b6   :  { %v717_v6 = vsel %vm436_vm15, %v709_v4, -inf }
 0x5b7   :  { %718 = vmax.xlane.f32.xlu0 %v717_v6 }
 0x5bb   :  { %721 = vmax.xlane.f32.xlu0 %v720_v23 }
 0x5c3   :  { %3202 = vrot.lane.b32.xlu1 %v3201_v10, %s3366_s27 }
 0x63f   :  { %v716_v21 = vpop.xlane.xlu1 %715 }
 0x640   :  { %v724_v11 = vsub.f32 %v708_v3, %v716_v21  ;;  %v713_v12 = vpop.xlane.xlu0 %712 }
 0x641   :  { %v723_v15 = vsub.f32 %v707_v16, %v713_v12 }
 0x642   :  { %v729_v26 = vmul.f32 1.442695, %v724_v11 }
 0x643   :  { %v727_v27 = vmul.f32 1.442695, %v723_v15  ;;  %v3203_v28 = vpop.permute.xlu1 %3202 }
 0x644   :  { %3266 = vpow2.f32 %v729_v26  ;;  %v719_v29 = vpop.xlane.xlu0 %718  ;;  %v3205_v30 = vunpack.i.h.bf16 %v3203_v28  ;;  %v3204_v31 = vunpack.i.l.bf16 %v3203_v28  ;;  %v905_v28 = vld [vmem:[%s4360_s8] sm:$0xff] }
 0x645   :  { %3268 = vpow2.f32 %v727_v27  ;;  %v725_v32 = vsub.f32 %v709_v4, %v719_v29  ;;  %v906_v29 = vld [vmem:[%s4360_s8 + $0x8] sm:$0xff] }
 0x646   :  { %v3022_v38 = vpack.c.bf16 %v3205_v30, %v3204_v31  ;;  %v3034_v30 = vpack.c.bf16 %v906_v29, %v905_v28  ;;  %v907_v31 = vld [vmem:[%s4360_s8 + $0x10] sm:$0xff] }
 0x647   :  { %v731_v43 = vmul.f32 1.442695, %v725_v32  ;;  %v908_v32 = vld [vmem:[%s4360_s8 + $0x18] sm:$0xff]  ;;  %v1016_v29 = vld [vmem:[%s4361_s9 + $0x10] sm:$0xff] }
 0x648   :  { %v722_v54 = vpop.xlane.xlu0 %721  ;;  %3023 = vmatprep.subr.bf16.mxu1 %v3022_v38 }
 0x649   :  { %3270 = vpow2.f32 %v731_v43  ;;  %v726_v2 = vsub.f32 %v710_v9, %v722_v54  ;;  %3025 = vmatpush3.bf16.msra.mxu1 %v3022_v38  ;;  %v3038_v38 = vpack.c.bf16 %v908_v32, %v907_v31  ;;  %v1123_v43 = vld [vmem:[%s4362_s10] sm:$0xff]  ;;  %v1124_v54 = vld [vmem:[%s4362_s10 + $0x8] sm:$0xff] }
 0x64a   :  { %v2501_v32 = vld [vmem:[%s4359_s7 + $0x20] sm:$0xff] }
 0x64b   :  { %v733_v5 = vmul.f32 1.442695, %v726_v2  ;;  %v3050_v2 = vpack.c.bf16 %v1124_v54, %v1123_v43 }
 0x64d   :  { %3272 = vpow2.f32 %v733_v5 }
 0x64e   :  { %v3267_v55 = vpop.eup %3266 }
 0x64f   :  { %v3269_v58 = vpop.eup %3268  ;;  %v738_v40 = vsel %vm436_vm15, %v3267_v55, 0.0 }
 0x650   :  { %739 = vadd.xlane.f32.xlu0 %v738_v40  ;;  %v735_v41 = vsel %vm436_vm15, %v3269_v58, 0.0 }
 0x651   :  { %736 = vadd.xlane.f32.xlu1 %v735_v41 }
 0x653   :  { %v3271_v13 = vpop.eup %3270 }
 0x654   :  { %v741_v3 = vsel %vm436_vm15, %v3271_v13, 0.0 }
 0x655   :  { %742 = vadd.xlane.f32.xlu1 %v741_v3 }
 0x657   :  { %v3273_v14 = vpop.eup %3272 }
 0x658   :  { %v744_v16 = vsel %vm436_vm15, %v3273_v14, 0.0 }
 0x659   :  { %745 = vadd.xlane.f32.xlu0 %v744_v16  ;;  %v1125_v16 = vld [vmem:[%s4362_s10 + $0x10] sm:$0xff] }
 0x666   :  { %3212 = vrot.lane.b32.xlu1 %v3211_v59, %s3366_s27  ;;  %v1126_v59 = vld [vmem:[%s4362_s10 + $0x18] sm:$0xff] }
 0x66a   :  { %876 = vrot.lane.b32.xlu1 %v569_v45, %s3370_s17 }
 0x66f   :  { %3207 = vrot.lane.b32.xlu0 %v3206_v60, %s3366_s27 }
 0x673   :  { %878 = vrot.lane.b32.xlu0 %v3850_v44, %s3370_s17 }
 0x6dd   :  { %v740_v62 = vpop.xlane.xlu0 %739 }
 0x6de   :  { %v737_v61 = vpop.xlane.xlu1 %736 }
 0x6df   :  { %3274 = vrcp.f32 %v737_v61 }
 0x6e0   :  { %3276 = vrcp.f32 %v740_v62 }
 0x6e2   :  { %v743_v63 = vpop.xlane.xlu1 %742 }
 0x6e3   :  { %3278 = vrcp.f32 %v743_v63 }
 0x6e6   :  { %v746_v4 = vpop.xlane.xlu0 %745  ;;  %v3213_v36 = vpop.permute.xlu1 %3212 }
 0x6e7   :  { %v3215_v45 = vunpack.i.h.bf16 %v3213_v36  ;;  %v3214_v23 = vunpack.i.l.bf16 %v3213_v36  ;;  %3280 = vrcp.f32 %v746_v4 }
 0x6e9   :  { %v3275_v37 = vpop.eup %3274  ;;  %v3030_v44 = vpack.c.bf16 %v3215_v45, %v3214_v23  ;;  %v1129_v23 = vld [vmem:[%s4362_s10 + $0x30] sm:$0xff] }
 0x6ea   :  { %v3208_v6 = vpop.permute.xlu0 %3207  ;;  %v751_v9 = vmul.f32 %v3275_v37, %v3269_v58  ;;  %v3277_v21 = vpop.eup %3276 }
 0x6eb   :  { %v3210_v10 = vunpack.i.h.bf16 %v3208_v6  ;;  %v3209_v7 = vunpack.i.l.bf16 %v3208_v6  ;;  %v752_v12 = vmul.f32 %v3277_v21, %v3267_v55  ;;  %v3054_v6 = vpack.c.bf16 %v1126_v59, %v1125_v16 }
 0x6ec   :  { %2795 = vmatprep.mubr.msk.f32.mxu1 %vm436_vm15, %v751_v9 }
 0x6ed   :  { %v3026_v8 = vpack.c.bf16 %v3210_v10, %v3209_v7  ;;  %v3279_v11 = vpop.eup %3278  ;;  %v1130_v10 = vld [vmem:[%s4362_s10 + $0x38] sm:$0xff] }
 0x6ee   :  { %v753_v26 = vmul.f32 %v3279_v11, %v3271_v13  ;;  %v879_v41 = vpop.permute.xlu0 %878  ;;  %v877_v13 = vpop.permute.xlu1 %876  ;;  %v3062_v7 = vpack.c.bf16 %v1130_v10, %v1129_v23 }
 0x6ef   :  { %3027 = vmatprep.subr.bf16.mxu1 %v3026_v8  ;;  %v898_v60 = vsel %vm318_vm1, %v3848_v57, %v877_v13  ;;  %v899_v62 = vsel %vm318_vm1, %v3846_v56, %v879_v41  ;;  %v1127_v57 = vld [vmem:[%s4362_s10 + $0x20] sm:$0xff]  ;;  %v1128_v56 = vld [vmem:[%s4362_s10 + $0x28] sm:$0xff]  ;;  %v1010_v41 = vsub.s32 1, %v3506_v22 }
 0x6f0   :  { %3029 = vmatpush3.bf16.msra.mxu1 %v3026_v8  ;;  %v3058_v45 = vpack.c.bf16 %v1128_v56, %v1127_v57  ;;  %v2570_v22 = vld [vmem:[%s4362_s10 + $0x48] sm:$0xff] }
 0x6f1   :  { %3031 = vmatprep.subr.bf16.mxu1 %v3030_v44  ;;  %v3281_v15 = vpop.eup %3280 }
 0x6f2   :  { %v754_v27 = vmul.f32 %v3281_v15, %v3273_v14 }
 0x6f4   :  { %3033 = vmatpush3.bf16.msra.mxu1 %v3030_v44 }
 0x6f5   :  { %3035 = vmatprep.subr.bf16.mxu1 %v3034_v30 }
 0x6f7   :  { %2796 = vmatmul.mubr.msk.f32.vlgmr.msra.gmra.mrb[4].mxu1 %vm436_vm15, %v752_v12 }
 0x6f8   :  { %2798 = vmatprep.mubr.msk.f32.mxu1 %vm436_vm15, %v753_v26  ;;  %3037 = vmatpush3.bf16.msra.mxu1 %v3034_v30  ;;  %v1017_v30 = vld [vmem:[%s4361_s9 + $0x18] sm:$0xff] }
 0x6f9   :  { %3039 = vmatprep.subr.bf16.mxu1 %v3038_v38  ;;  %v3046_v31 = vpack.c.bf16 %v1017_v30, %v1016_v29 }
 0x6fb   :  { %2799 = vmatmul.mubr.msk.f32.gmra.mrb[6].mxu1 %vm436_vm15, %v754_v27 }
 0x6fc   :  { %3041 = vmatpush3.bf16.msra.mxu1 %v3038_v38  ;;  %v2502_v38 = vld [vmem:[%s4359_s7 + $0x28] sm:$0xff] }
 0x6fd   :  { %3051 = vmatprep.subr.bf16.mxu1 %v3050_v2  ;;  %v3066_v43 = vpack.c.bf16 %v2502_v38, %v2501_v32 }
 0x7ca   :  { %v2797_v5 = vpop.f32.mrb[4].mxu1 }
 0x7cb   :  { %886 = vrot.lane.b32.xlu0 %v2797_v5, %s3371_s19  ;;  %v855_v55 = vpop.f32.mrb[5].mxu1 }
 0x7cc   :  { %884 = vrot.lane.b32.xlu1 %v855_v55, %s3371_s19 }
 0x7ce   :  { %v2800_v58 = vpop.f32.mrb[6].mxu1 }
 0x7cf   :  { %894 = vrot.lane.b32.xlu0 %v2800_v58, %s3372_s22  ;;  %v865_v40 = vpop.f32.mrb[7].mxu1 }
 0x7d0   :  { %892 = vrot.lane.b32.xlu1 %v865_v40, %s3372_s22 }
 0x83d   :  { %v887_v3 = vpop.permute.xlu0 %886 }
 0x83e   :  { %v885_v14 = vpop.permute.xlu1 %884  ;;  %v901_v36 = vsel %vm276_vm3, %v899_v62, %v887_v3  ;;  %v1011_v3 = vrot.slane %v3512_v25, %v1010_v41 }
 0x83f   :  { %v900_v63 = vsel %vm276_vm3, %v898_v60, %v885_v14  ;;  %v2503_v60 = vld [vmem:[%s4359_s7 + $0x30] sm:$0xff] }
 0x841   :  { %v895_v61 = vpop.permute.xlu0 %894 }
 0x842   :  { %v893_v4 = vpop.permute.xlu1 %892  ;;  %v904_v9 = vsel %vm902_vm4, %v901_v36, %v895_v61  ;;  %v2504_v61 = vld [vmem:[%s4359_s7 + $0x38] sm:$0xff] }
 0x843   :  { %v903_v37 = vsel %vm902_vm4, %v900_v63, %v893_v4  ;;  %v3070_v4 = vpack.c.bf16 %v2504_v61, %v2503_v60  ;;  %v4020_v60 = vld [vmem:[%s4356_s4 + $0x30] sm:$0xff]  ;;  %v4025_v61 = vld [vmem:[%s4356_s4 + $0x38] sm:$0xff] }
 0x844   :  { %2809 = vmatprep.mubr.msk.f32.mxu1 %vm104_vm0, %v903_v37 }
 0x845   :  { %2810 = vmatmul.mubr.msk.f32.vlgmr.msra.gmra.mrb[8].mxu1 %vm104_vm0, %v904_v9 }
 0x846   :  { %3053 = vmatpush3.bf16.msra.mxu1 %v3050_v2 }
 0x847   :  { %3055 = vmatprep.subr.bf16.mxu1 %v3054_v6 }
 0x84a   :  { %3057 = vmatpush3.bf16.msra.mxu1 %v3054_v6 }
 0x84b   :  { %3059 = vmatprep.subr.bf16.mxu1 %v3058_v45 }
 0x84e   :  { %3061 = vmatpush3.bf16.msra.mxu1 %v3058_v45 }
 0x84f   :  { %3063 = vmatprep.subr.bf16.mxu1 %v3062_v7 }
 0x852   :  { %3065 = vmatpush3.bf16.msra.mxu1 %v3062_v7 }
 0x853   :  { %3093 = vmatprep.subr.bf16.mxu1 %v3801_v52 }
 0x918   :  { %v2811_v8 = vpop.f32.mrb[8].mxu1 }
 0x919   :  { %v3932_v44 = vadd.f32 %v2811_v8, %v3465_v1  ;;  %v981_v21 = vpop.f32.mrb[9].mxu1  ;;  %v1014_v1 = vld [vmem:[%s4361_s9] sm:$0xff] }
 0x91a   :  { %v3935_v11 = vadd.f32 %v981_v21, %v3460_v0  ;;  %v1015_v0 = vld [vmem:[%s4361_s9 + $0x8] sm:$0xff] }
 0x91b   :  { %v993_v12 = vmul.f32 %v3932_v44, %v3932_v44  ;;  %v3042_v28 = vpack.c.bf16 %v1015_v0, %v1014_v1 }
 0x91c   :  { %v992_v15 = vmul.f32 %v3935_v11, %v3935_v11 }
 0x91d   :  { %v997_v26 = vsel %vm104_vm0, %v993_v12, 0.0  ;;  %3043 = vmatprep.subr.bf16.mxu0 %v3042_v28 }
 0x91e   :  { %998 = vadd.xlane.f32.xlu0 %v997_v26  ;;  %v994_v27 = vsel %vm104_vm0, %v992_v15, 0.0  ;;  %3045 = vmatpush3.bf16.msra.mxu0 %v3042_v28  ;;  %v3983_v26 = vld [vmem:[%s4357_s5 + $0x30] sm:$0xff] }
 0x91f   :  { %995 = vadd.xlane.f32.xlu1 %v994_v27  ;;  %3047 = vmatprep.subr.bf16.mxu0 %v3046_v31  ;;  %v3988_v27 = vld [vmem:[%s4357_s5 + $0x38] sm:$0xff] }
 0x920   :  { %v3096_v0 = vpack.c.bf16 %v3988_v27, %v3983_v26 }
 0x922   :  { %3049 = vmatpush3.bf16.msra.mxu0 %v3046_v31 }
 0x923   :  { %3067 = vmatprep.subr.bf16.mxu0 %v3066_v43 }
 0x9ab   :  { %v999_v54 = vpop.xlane.xlu0 %998 }
 0x9ac   :  { %v1001_v2 = vmul.f32 0.03125, %v999_v54  ;;  %v996_v5 = vpop.xlane.xlu1 %995 }
 0x9ad   :  { %v1000_v55 = vmul.f32 0.03125, %v996_v5 }
 0x9ae   :  { %v1003_v58 = vadd.f32 1e-05, %v1001_v2 }
 0x9af   :  { %v1002_v40 = vadd.f32 1e-05, %v1000_v55 }
 0x9b0   :  { %3282 = vrsqrt.f32 %v1003_v58 }
 0x9b1   :  { %3284 = vrsqrt.f32 %v1002_v40 }
 0x9ba   :  { %v3283_v13 = vpop.eup %3282 }
 0x9bb   :  { %v3285_v14 = vpop.eup %3284  ;;  %v1007_v16 = vmul.f32 %v3283_v13, %v3932_v44 }
 0x9bc   :  { %v1006_v59 = vmul.f32 %v3285_v14, %v3935_v11 }
 0x9bd   :  { %v1013_v63 = vmul.f32 %v1011_v3, %v1007_v16 }
 0x9be   :  { %v1012_v62 = vmul.f32 %v1011_v3, %v1006_v59 }
 0x9c0   :  { %2820 = vmatprep.mubr.msk.f32.mxu0 %vm104_vm0, %v1012_v62 }
 0x9c1   :  { %2821 = vmatmul.mubr.msk.f32.vlgmr.msra.gmra.mrb[10].mxu0 %vm104_vm0, %v1013_v63 }
 0x9c2   :  { %3069 = vmatpush3.bf16.msra.mxu0 %v3066_v43 }
 0x9c3   :  { %3071 = vmatprep.subr.bf16.mxu0 %v3070_v4 }
 0x9c6   :  { %3073 = vmatpush3.bf16.msra.mxu0 %v3070_v4 }
 0x9c7   :  { %3076 = vmatprep.subr.msk.bf16.mxu0 %vm3547_vm2, %v3679_v19 }
 0xa94   :  { %v2822_v25 = vpop.f32.mrb[10].mxu0 }
 0xa95   :  { %1117 = vrot.lane.b32.xlu1 %v2822_v25, %s3364_s21  ;;  %v1090_v36 = vpop.f32.mrb[11].mxu0  ;;  %v2497_v6 = vmul.f32 -1.442695, %v2822_v25 }
 0xa96   :  { %1115 = vrot.lane.b32.xlu0 %v1090_v36, %s3364_s21  ;;  %v2496_v37 = vmul.f32 -1.442695, %v1090_v36 }
 0xa98   :  { %3286 = vpow2.f32 %v2496_v37 }
 0xa99   :  { %3288 = vpow2.f32 %v2497_v6 }
 0xaa2   :  { %v3287_v9 = vpop.eup %3286 }
 0xaa3   :  { %v3289_v57 = vpop.eup %3288  ;;  %v1105_v56 = vadd.f32 1.0, %v3287_v9 }
 0xaa4   :  { %v1106_v45 = vadd.f32 1.0, %v3289_v57 }
 0xaa5   :  { %3290 = vrcp.f32 %v1105_v56 }
 0xaa6   :  { %3292 = vrcp.f32 %v1106_v45 }
 0xaaf   :  { %v3291_v23 = vpop.eup %3290 }
 0xab0   :  { %v3293_v10 = vpop.eup %3292  ;;  %v1111_v8 = vmul.f32 %v3291_v23, %v1090_v36 }
 0xab1   :  { %v1112_v21 = vmul.f32 %v3293_v10, %v2822_v25 }
 0xb07   :  { %v1118_v7 = vpop.permute.xlu1 %1117 }
 0xb08   :  { %v1116_v12 = vpop.permute.xlu0 %1115  ;;  %v1122_v1 = vmul.f32 %v1118_v7, %v1112_v21 }
 0xb09   :  { %v1121_v15 = vmul.f32 %v1116_v12, %v1111_v8 }
 0xb0b   :  { %2839 = vmatprep.mubr.msk.f32.mxu1 %vm1131_vm5, %v1121_v15 }
 0xb0c   :  { %2840 = vmatmul.mubr.msk.f32.vlgmr.msra.gmra.mrb[10].mxu1 %vm1131_vm5, %v1122_v1 }
 0xb0d   :  { %3095 = vmatpush3.bf16.msra.mxu1 %v3801_v52 }
 0xb0e   :  { %3097 = vmatprep.subr.bf16.mxu1 %v3096_v0 }
 0xb11   :  { %3099 = vmatpush3.bf16.msra.mxu1 %v3096_v0 }
 0xbdf   :  { %v2841_v28 = vpop.f32.mrb[10].mxu1 }
 0xbe0   :  { %v3996_v29 = vadd.f32 %v2841_v28, %v3932_v44  ;;  %v1204_v30 = vpop.f32.mrb[11].mxu1 }
 0xbe1   :  { %v3999_v31 = vadd.f32 %v1204_v30, %v3935_v11  ;;  %v4010_v11 = vld [vmem:[%s4358_s6 + $0x2] sm:$0x3] }
 0xbe2   :  { %v1218_v32 = vmul.f32 %v3996_v29, %v3996_v29  ;;  %v1236_v13 = vrot.slane %v4010_v11, %v127_v24  ;;  %v3080_v24 = vpack.c.bf16 %v4025_v61, %v4020_v60 }
 0xbe3   :  { %v1217_v38 = vmul.f32 %v3999_v31, %v3999_v31 }
 0xbe4   :  { %v1222_v43 = vsel %vm104_vm0, %v1218_v32, 0.0 }
 0xbe5   :  { %1223 = vadd.xlane.f32.xlu0 %v1222_v43  ;;  %v1219_v52 = vsel %vm104_vm0, %v1217_v38, 0.0 }
 0xbe6   :  { %1220 = vadd.xlane.f32.xlu1 %v1219_v52 }
 0xc72   :  { %v1224_v54 = vpop.xlane.xlu0 %1223 }
 0xc73   :  { %v1226_v2 = vmul.f32 0.03125, %v1224_v54  ;;  %v1221_v44 = vpop.xlane.xlu1 %1220 }
 0xc74   :  { %v1225_v5 = vmul.f32 0.03125, %v1221_v44 }
 0xc75   :  { %v1228_v55 = vadd.f32 1e-05, %v1226_v2 }
 0xc76   :  { %v1227_v58 = vadd.f32 1e-05, %v1225_v5 }
 0xc77   :  { %3294 = vrsqrt.f32 %v1228_v55 }
 0xc78   :  { %3296 = vrsqrt.f32 %v1227_v58 }
 0xc81   :  { %v3295_v40 = vpop.eup %3294 }
 0xc82   :  { %v3297_v3 = vpop.eup %3296  ;;  %v1232_v14 = vmul.f32 %v3295_v40, %v3996_v29 }
 0xc83   :  { %v1231_v16 = vmul.f32 %v3297_v3, %v3999_v31 }
 0xc84   :  { %v1238_v62 = vmul.f32 %v1236_v13, %v1232_v14 }
 0xc85   :  { %v1237_v59 = vmul.f32 %v1236_v13, %v1231_v16 }
 0xc87   :  { %2850 = vmatprep.mubr.msk.f32.mxu0 %vm104_vm0, %v1237_v59 }
 0xc88   :  { %2851 = vmatmul.mubr.msk.f32.vlgmr.msra.gmra.mrb[12].mxu0 %vm104_vm0, %v1238_v62 }
 0xc89   :  { %3079 = vmatpush3.bf16.xpose.msk.msra.mxu0 %vm3547_vm2, %v3679_v19 }
 0xc8a   :  { %3082 = vmatprep.subr.msk.bf16.mxu0 %vm3547_vm2, %v3080_v24 }
 0xc91   :  { %3085 = vmatpush3.bf16.xpose.msk.msra.mxu0 %vm3547_vm2, %v3080_v24 }
 0xd5b   :  { %v4038_v63 = vpop.f32.mrb[12].mxu0 }
 0xd5c   :  { %v4040_v4 = vpop.f32.mrb[13].mxu0  ;;  %v1342_v25 = vmul.f32 %v4038_v63, %v3523_v34  ;;  %v1328_v37 = vmul.f32 %v4038_v63, %v3525_v35  ;;  %v1340_v34 = vmul.f32 %v4038_v63, %v3595_v51  ;;  %v3346_v35 = vld [vmem:[%s4354_s2] sm:$0xff] }
 0xd5d   :  { %v1341_v36 = vmul.f32 %v4040_v4, %v3521_v33  ;;  %v1327_v19 = vmul.f32 %v4040_v4, %v3583_v48  ;;  %v1339_v33 = vmul.f32 %v4040_v4, %v3593_v50  ;;  %v1325_v48 = vmul.f32 %v3346_v35, %v4040_v4  ;;  %v3347_v50 = vld [vmem:[%s4354_s2 + $0x8] sm:$0xff] }
 0xd5e   :  { %1347 = vrot.lane.b32.xlu1 %v1342_v25, %s3364_s21  ;;  %v1326_v51 = vmul.f32 %v3347_v50, %v4038_v63 }
 0xd5f   :  { %1345 = vrot.lane.b32.xlu0 %v1341_v36, %s3364_s21 }
 0xd62   :  { %1331 = vrot.lane.b32.xlu1 %v1327_v19, %s3364_s21 }
 0xd63   :  { %1333 = vrot.lane.b32.xlu0 %v1328_v37, %s3364_s21 }
 0xdd0   :  { %v1348_v6 = vpop.permute.xlu1 %1347 }
 0xdd1   :  { %v1352_v9 = vadd.f32 %v1348_v6, %v1340_v34  ;;  %v1346_v57 = vpop.permute.xlu0 %1345 }
 0xdd2   :  { %v1351_v56 = vadd.f32 %v1346_v57, %v1339_v33 }
 0xdd3   :  { %1391 = vrot.lane.b32.xlu0 %v1352_v9, %s3363_s20 }
 0xdd4   :  { %1372 = vrot.lane.b32.xlu1 %v1351_v56, %s3363_s20  ;;  %v1332_v45 = vpop.permute.xlu1 %1331  ;;  %v3221_v56 = vpack.i.bf16 %v4025_v61, %v4020_v60 }
 0xdd5   :  { %v4068_v23 = vadd.f32 %v1332_v45, %v1325_v48  ;;  %v1334_v10 = vpop.permute.xlu0 %1333 }
 0xdd6   :  { %v4070_v7 = vadd.f32 %v1334_v10, %v1326_v51 }
 0xdd7   :  { %2865 = vmatprep.mubr.msk.f32.mxu0 %vm318_vm1, %v4068_v23 }
 0xdd8   :  { %1407 = vrot.lane.b32.xlu0 %v4070_v7, %s3366_s27  ;;  %1405 = vrot.lane.b32.xlu1 %v4068_v23, %s3366_s27 }
 0xe45   :  { %v4078_v8 = vpop.permute.xlu0 %1391 }
 0xe46   :  { %v4080_v21 = vpop.permute.xlu1 %1372 }
 0xe47   :  { %2519 = vst.msk [vmem:[%s3627_s1 + $0x20] sm:$0xff] %vm276_vm3, %v4080_v21  ;;  %v3086_v12 = vpack.c.bf16 %v4078_v8, %v4080_v21  ;;  %v3226_v15 = vpack.i.bf16 %v4078_v8, %v4080_v21 }
 0xe48   :  { %2521 = vst.msk [vmem:[%s4366_s14 + $0x30] sm:$0xff] %vm276_vm3, %v4020_v60  ;;  %2522 = vst.msk [vmem:[%s4366_s14 + $0x38] sm:$0xff] %vm276_vm3, %v4025_v61 }
 0xe49   :  { %2525 = vst.msk [vmem:[%s3627_s1 + $0x30] sm:$0xff] %vm276_vm3, %v4078_v8  ;;  %3088 = vmatprep.subr.msk.bf16.mxu0 %vm3547_vm2, %v3086_v12 }
 0xe4a   :  { %3091 = vmatpush3.bf16.xpose.msk.msra.mxu0 %vm3547_vm2, %v3086_v12  ;;  %v4106_v1 = vpop.permute.xlu1 %1405  ;;  %v4112_v0 = vpop.permute.xlu0 %1407 }
 0xe51   :  { %2866 = vmatmul.mubr.msk.f32.vlgmr.msra.gmra.mrb[14].mxu0 %vm318_vm1, %v4070_v7 }
 0xe52   :  { %2868 = vmatprep.mubr.msk.f32.mxu0 %vm318_vm1, %v4106_v1 }
 0xe55   :  { %2869 = vmatmul.mubr.msk.f32.gmra.mrb[16].mxu0 %vm318_vm1, %v4112_v0 }
 0xf24   :  { %v2867_v28 = vpop.f32.mrb[14].mxu0 }
 0xf25   :  { %v1519_v30 = vmul.f32 0.35355338, %v2867_v28  ;;  %v1499_v32 = vpop.f32.mrb[15].mxu0 }
 0xf26   :  { %v1518_v38 = vmul.f32 0.35355338, %v1499_v32 }
 0xf27   :  { %v1523_v43 = vadd.f32 %v1519_v30, %v3695_v39 }
 0xf28   :  { %v2870_v52 = vpop.f32.mrb[16].mxu0  ;;  %v1522_v54 = vadd.f32 %v1518_v38, %v3698_v47 }
 0xf29   :  { %v1521_v2 = vmul.f32 0.35355338, %v2870_v52  ;;  %v1509_v44 = vpop.f32.mrb[17].mxu0  ;;  %v1529_v5 = vsel %vm436_vm15, %v1523_v43, -inf }
 0xf2a   :  { %v1520_v55 = vmul.f32 0.35355338, %v1509_v44  ;;  %1530 = vmax.xlane.f32.xlu0 %v1529_v5  ;;  %v1526_v58 = vsel %vm436_vm15, %v1522_v54, -inf }
 0xf2b   :  { %1527 = vmax.xlane.f32.xlu1 %v1526_v58  ;;  %v1525_v40 = vadd.f32 %v1521_v2, %v3695_v39 }
 0xf2c   :  { %v1524_v13 = vadd.f32 %v1520_v55, %v3698_v47 }
 0xf2d   :  { %v1535_v3 = vsel %vm436_vm15, %v1525_v40, -inf }
 0xf2e   :  { %v1532_v14 = vsel %vm436_vm15, %v1524_v13, -inf }
 0xf2f   :  { %1536 = vmax.xlane.f32.xlu1 %v1535_v3  ;;  %1533 = vmax.xlane.f32.xlu0 %v1532_v14 }
 0xf40   :  { %1398 = vrot.lane.b32.xlu1 %v4038_v63, %s3368_s28 }
 0xf45   :  { %1379 = vrot.lane.b32.xlu0 %v4040_v4, %s3368_s28 }
 0xfb7   :  { %v1531_v16 = vpop.xlane.xlu0 %1530 }
 0xfb8   :  { %v1539_v59 = vsub.f32 %v1523_v43, %v1531_v16  ;;  %v1528_v62 = vpop.xlane.xlu1 %1527 }
 0xfb9   :  { %v1538_v24 = vsub.f32 %v1522_v54, %v1528_v62 }
 0xfba   :  { %v1544_v25 = vmul.f32 1.442695, %v1539_v59 }
 0xfbb   :  { %v1542_v36 = vmul.f32 1.442695, %v1538_v24 }
 0xfbc   :  { %3298 = vpow2.f32 %v1544_v25  ;;  %v1537_v19 = vpop.xlane.xlu1 %1536  ;;  %v1534_v37 = vpop.xlane.xlu0 %1533 }
 0xfbd   :  { %3300 = vpow2.f32 %v1542_v36  ;;  %v1541_v35 = vsub.f32 %v1525_v40, %v1537_v19  ;;  %v1540_v45 = vsub.f32 %v1524_v13, %v1534_v37 }
 0xfbf   :  { %v1548_v48 = vmul.f32 1.442695, %v1541_v35  ;;  %v1546_v50 = vmul.f32 1.442695, %v1540_v45 }
 0xfc0   :  { %v4128_v34 = vpop.permute.xlu1 %1398  ;;  %v4130_v6 = vpop.permute.xlu0 %1379 }
 0xfc1   :  { %2520 = vst.msk [vmem:[%s3753_s16 + $0x20] sm:$0xff] %vm276_vm3, %v4130_v6  ;;  %v3100_v63 = vpack.c.bf16 %v4128_v34, %v4130_v6  ;;  %3302 = vpow2.f32 %v1548_v48 }
 0xfc2   :  { %2523 = vst.msk [vmem:[%s4367_s15 + $0x30] sm:$0xff] %vm276_vm3, %v3983_v26  ;;  %2524 = vst.msk [vmem:[%s4367_s15 + $0x38] sm:$0xff] %vm276_vm3, %v3988_v27  ;;  %3304 = vpow2.f32 %v1546_v50 }
 0xfc3   :  { %2526 = vst.msk [vmem:[%s3753_s16 + $0x30] sm:$0xff] %vm276_vm3, %v4128_v34  ;;  %3101 = vmatprep.subr.bf16.mxu1 %v3100_v63 }
 0xfc4   :  { %3103 = vmatpush3.bf16.msra.mxu1 %v3100_v63 }
 0xfc6   :  { %v3299_v4 = vpop.eup %3298 }
 0xfc7   :  { %v3301_v33 = vpop.eup %3300  ;;  %v1553_v9 = vsel %vm436_vm15, %v3299_v4, 0.0 }
 0xfc8   :  { %1554 = vadd.xlane.f32.xlu1 %v1553_v9  ;;  %v1550_v57 = vsel %vm436_vm15, %v3301_v33, 0.0 }
 0xfc9   :  { %1551 = vadd.xlane.f32.xlu0 %v1550_v57 }
 0xfcb   :  { %v3303_v51 = vpop.eup %3302 }
 0xfcc   :  { %v1559_v60 = vsel %vm436_vm15, %v3303_v51, 0.0  ;;  %v3305_v61 = vpop.eup %3304 }
 0xfcd   :  { %v1556_v10 = vsel %vm436_vm15, %v3305_v61, 0.0 }
 0xfd9   :  { %3222 = vrot.lane.b32.xlu1 %v3221_v56, %s3366_s27 }
 0xfdd   :  { %3227 = vrot.lane.b32.xlu1 %v3226_v15, %s3366_s27 }
 0xfdf   :  { %3217 = vrot.lane.b32.xlu0 %v3216_v20, %s3366_s27 }
 0xfe1   :  { %1669 = vrot.lane.b32.xlu1 %v4070_v7, %s3369_s25 }
 0xffe   :  { %1560 = vadd.xlane.f32.xlu0 %v1559_v60 }
0x1005   :  { %1557 = vadd.xlane.f32.xlu1 %v1556_v10 }
0x1014   :  { %1667 = vrot.lane.b32.xlu0 %v4068_v23, %s3369_s25 }
0x1016   :  { %1673 = vrot.lane.b32.xlu1 %v4112_v0, %s3369_s25 }
0x1018   :  { %1671 = vrot.lane.b32.xlu0 %v4106_v1, %s3369_s25 }
0x1055   :  { %v1555_v17 = vpop.xlane.xlu1 %1554 }
0x1056   :  { %3306 = vrcp.f32 %v1555_v17  ;;  %v1552_v18 = vpop.xlane.xlu0 %1551 }
0x1057   :  { %3308 = vrcp.f32 %v1552_v18 }
0x1059   :  { %v3223_v12 = vpop.permute.xlu1 %3222 }
0x105a   :  { %v3218_v20 = vpop.permute.xlu0 %3217  ;;  %v3225_v28 = vunpack.i.h.bf16 %v3223_v12  ;;  %v3224_v30 = vunpack.i.l.bf16 %v3223_v12 }
0x105b   :  { %v3220_v7 = vunpack.i.h.bf16 %v3218_v20  ;;  %v3219_v8 = vunpack.i.l.bf16 %v3218_v20 }
0x105c   :  { %v3110_v1 = vpack.c.bf16 %v3225_v28, %v3224_v30 }
0x105d   :  { %v3104_v21 = vpack.c.bf16 %v3220_v7, %v3219_v8  ;;  %v3228_v38 = vpop.permute.xlu1 %3227 }
0x105e   :  { %v3230_v43 = vunpack.i.h.bf16 %v3228_v38  ;;  %v3229_v52 = vunpack.i.l.bf16 %v3228_v38 }
0x105f   :  { %3106 = vmatprep.subr.msk.bf16.mxu1 %vm3547_vm2, %v3104_v21 }
0x1060   :  { %v3307_v15 = vpop.eup %3306  ;;  %v3116_v54 = vpack.c.bf16 %v3230_v43, %v3229_v52 }
0x1061   :  { %v3309_v23 = vpop.eup %3308  ;;  %v1567_v32 = vmul.f32 %v3307_v15, %v3299_v4  ;;  %v1670_v2 = vpop.permute.xlu1 %1669 }
0x1062   :  { %v1566_v0 = vmul.f32 %v3309_v23, %v3301_v33 }
0x1064   :  { %2883 = vmatprep.mubr.msk.f32.mxu1 %vm436_vm15, %v1566_v0 }
0x1065   :  { %2884 = vmatmul.mubr.msk.f32.vlgmr.msra.gmra.mrb[12].mxu1 %vm436_vm15, %v1567_v32 }
0x1066   :  { %3109 = vmatpush3.bf16.xpose.msk.msra.mxu1 %vm3547_vm2, %v3104_v21 }
0x1067   :  { %3112 = vmatprep.subr.msk.bf16.mxu1 %vm3547_vm2, %v3110_v1 }
0x106e   :  { %3115 = vmatpush3.bf16.xpose.msk.msra.mxu1 %vm3547_vm2, %v3110_v1 }
0x106f   :  { %3118 = vmatprep.subr.msk.bf16.mxu1 %vm3547_vm2, %v3116_v54 }
0x1076   :  { %3121 = vmatpush3.bf16.xpose.msk.msra.mxu1 %vm3547_vm2, %v3116_v54  ;;  %v3241_v54 = vpack.i.bf16 %v4128_v34, %v4130_v6 }
0x108b   :  { %v1561_v44 = vpop.xlane.xlu0 %1560 }
0x108c   :  { %3310 = vrcp.f32 %v1561_v44 }
0x108f   :  { %v1668_v13 = vpop.permute.xlu0 %1667 }
0x1092   :  { %v1558_v5 = vpop.xlane.xlu1 %1557 }
0x1093   :  { %3312 = vrcp.f32 %v1558_v5  ;;  %v1672_v14 = vpop.permute.xlu0 %1671 }
0x1096   :  { %v3311_v55 = vpop.eup %3310  ;;  %v1674_v42 = vpop.permute.xlu1 %1673 }
0x1097   :  { %v1569_v3 = vmul.f32 %v3311_v55, %v3303_v51 }
0x109d   :  { %v3313_v58 = vpop.eup %3312 }
0x109e   :  { %v1568_v40 = vmul.f32 %v3313_v58, %v3305_v61 }
0x10a0   :  { %2886 = vmatprep.mubr.msk.f32.mxu1 %vm436_vm15, %v1568_v40 }
0x10a1   :  { %2887 = vmatmul.mubr.msk.f32.gmra.mrb[14].mxu1 %vm436_vm15, %v1569_v3 }
0x10a2   :  { %2901 = vmatprep.mubr.msk.f32.mxu1 %vm318_vm1, %v1668_v13 }
0x10a5   :  { %2902 = vmatmul.mubr.msk.f32.vlgmr.msra.gmra.mrb[16].mxu1 %vm318_vm1, %v1670_v2  ;;  %v3236_v2 = vpack.i.bf16 %v3988_v27, %v3983_v26 }
0x10a6   :  { %2904 = vmatprep.mubr.msk.f32.mxu1 %vm318_vm1, %v1672_v14 }
0x10a9   :  { %2905 = vmatmul.mubr.msk.f32.gmra.mrb[18].mxu1 %vm318_vm1, %v1674_v42 }
0x1138   :  { %v4190_v16 = vpop.f32.mrb[12].mxu1 }
0x1139   :  { %v4192_v59 = vpop.f32.mrb[13].mxu1 }
0x1174   :  { %v2888_v62 = vpop.f32.mrb[14].mxu1 }
0x1175   :  { %v1658_v24 = vpop.f32.mrb[15].mxu1 }
0x1178   :  { %v2903_v25 = vpop.f32.mrb[16].mxu1 }
0x1179   :  { %v1793_v36 = vmul.f32 0.35355338, %v2903_v25  ;;  %v1773_v19 = vpop.f32.mrb[17].mxu1 }
0x117a   :  { %v1792_v37 = vmul.f32 0.35355338, %v1773_v19 }
0x117b   :  { %v1797_v63 = vadd.f32 %v1793_v36, %v3695_v39 }
0x117c   :  { %v2906_v4 = vpop.f32.mrb[18].mxu1  ;;  %v1796_v33 = vadd.f32 %v1792_v37, %v3698_v47 }
0x117d   :  { %v1783_v9 = vpop.f32.mrb[19].mxu1  ;;  %v1803_v57 = vsel %vm436_vm15, %v1797_v63, -inf  ;;  %v1795_v56 = vmul.f32 0.35355338, %v2906_v4  ;;  %v2555_v4 = vld [vmem:[%s4360_s8 + $0x20] sm:$0xff] }
0x117e   :  { %v1794_v35 = vmul.f32 0.35355338, %v1783_v9  ;;  %1804 = vmax.xlane.f32.xlu1 %v1803_v57  ;;  %v1800_v48 = vsel %vm436_vm15, %v1796_v33, -inf  ;;  %v2557_v57 = vld [vmem:[%s4360_s8 + $0x30] sm:$0xff] }
0x117f   :  { %1801 = vmax.xlane.f32.xlu0 %v1800_v48  ;;  %v1799_v51 = vadd.f32 %v1795_v56, %v3695_v39  ;;  %v2558_v56 = vld [vmem:[%s4360_s8 + $0x38] sm:$0xff] }
0x1180   :  { %v1798_v45 = vadd.f32 %v1794_v35, %v3698_v47  ;;  %v3138_v35 = vpack.c.bf16 %v2558_v56, %v2557_v57 }
0x1181   :  { %v1809_v60 = vsel %vm436_vm15, %v1799_v51, -inf }
0x1182   :  { %v1806_v50 = vsel %vm436_vm15, %v1798_v45, -inf }
0x1183   :  { %1807 = vmax.xlane.f32.xlu0 %v1806_v50 }
0x1187   :  { %1810 = vmax.xlane.f32.xlu0 %v1809_v60 }
0x118f   :  { %3232 = vrot.lane.b32.xlu1 %v3231_v53, %s3366_s27 }
0x120b   :  { %v1805_v61 = vpop.xlane.xlu1 %1804 }
0x120c   :  { %v1813_v10 = vsub.f32 %v1797_v63, %v1805_v61  ;;  %v1802_v17 = vpop.xlane.xlu0 %1801 }
0x120d   :  { %v1812_v18 = vsub.f32 %v1796_v33, %v1802_v17  ;;  %v2556_v33 = vld [vmem:[%s4360_s8 + $0x28] sm:$0xff] }
0x120e   :  { %v1818_v20 = vmul.f32 1.442695, %v1813_v10  ;;  %v3134_v9 = vpack.c.bf16 %v2556_v33, %v2555_v4 }
0x120f   :  { %v1816_v7 = vmul.f32 1.442695, %v1812_v18  ;;  %v3233_v47 = vpop.permute.xlu1 %3232 }
0x1210   :  { %3314 = vpow2.f32 %v1818_v20  ;;  %v3235_v8 = vunpack.i.h.bf16 %v3233_v47  ;;  %v3234_v21 = vunpack.i.l.bf16 %v3233_v47  ;;  %v1808_v39 = vpop.xlane.xlu0 %1807 }
0x1211   :  { %3316 = vpow2.f32 %v1816_v7  ;;  %v1814_v12 = vsub.f32 %v1798_v45, %v1808_v39 }
0x1212   :  { %v3122_v15 = vpack.c.bf16 %v3235_v8, %v3234_v21 }
0x1213   :  { %v1820_v23 = vmul.f32 1.442695, %v1814_v12 }
0x1214   :  { %3123 = vmatprep.subr.bf16.mxu0 %v3122_v15  ;;  %v1811_v28 = vpop.xlane.xlu0 %1810 }
0x1215   :  { %3318 = vpow2.f32 %v1820_v23  ;;  %v1815_v46 = vsub.f32 %v1799_v51, %v1811_v28  ;;  %3125 = vmatpush3.bf16.msra.mxu0 %v3122_v15 }
0x1217   :  { %v1822_v49 = vmul.f32 1.442695, %v1815_v46 }
0x1219   :  { %3320 = vpow2.f32 %v1822_v49 }
0x121a   :  { %v3315_v53 = vpop.eup %3314 }
0x121b   :  { %v3317_v30 = vpop.eup %3316  ;;  %v1827_v0 = vsel %vm436_vm15, %v3315_v53, 0.0 }
0x121c   :  { %1828 = vadd.xlane.f32.xlu0 %v1827_v0  ;;  %v1824_v32 = vsel %vm436_vm15, %v3317_v30, 0.0  ;;  %v2563_v0 = vld [vmem:[%s4361_s9 + $0x30] sm:$0xff] }
0x121d   :  { %1825 = vadd.xlane.f32.xlu1 %v1824_v32  ;;  %v2564_v32 = vld [vmem:[%s4361_s9 + $0x38] sm:$0xff] }
0x121f   :  { %v3319_v1 = vpop.eup %3318 }
0x1220   :  { %v1830_v38 = vsel %vm436_vm15, %v3319_v1, 0.0 }
0x1221   :  { %1831 = vadd.xlane.f32.xlu1 %v1830_v38 }
0x1223   :  { %v3321_v43 = vpop.eup %3320 }
0x1224   :  { %v1833_v52 = vsel %vm436_vm15, %v3321_v43, 0.0 }
0x1225   :  { %1834 = vadd.xlane.f32.xlu0 %v1833_v52 }
0x1232   :  { %3242 = vrot.lane.b32.xlu1 %v3241_v54, %s3366_s27 }
0x1236   :  { %1965 = vrot.lane.b32.xlu1 %v1658_v24, %s3370_s17 }
0x123b   :  { %3237 = vrot.lane.b32.xlu0 %v3236_v2, %s3366_s27 }
0x123f   :  { %1967 = vrot.lane.b32.xlu0 %v2888_v62, %s3370_s17 }
0x12a9   :  { %v1829_v5 = vpop.xlane.xlu0 %1828 }
0x12aa   :  { %v1826_v44 = vpop.xlane.xlu1 %1825 }
0x12ab   :  { %3322 = vrcp.f32 %v1826_v44 }
0x12ac   :  { %3324 = vrcp.f32 %v1829_v5 }
0x12ae   :  { %v1832_v55 = vpop.xlane.xlu1 %1831 }
0x12af   :  { %3326 = vrcp.f32 %v1832_v55  ;;  %v2100_v55 = vrot.slane %v4010_v11, %v1010_v41  ;;  %v2571_v41 = vld [vmem:[%s4362_s10 + $0x50] sm:$0xff] }
0x12b2   :  { %v1835_v58 = vpop.xlane.xlu0 %1834  ;;  %v3243_v40 = vpop.permute.xlu1 %3242 }
0x12b3   :  { %v3245_v3 = vunpack.i.h.bf16 %v3243_v40  ;;  %v3244_v14 = vunpack.i.l.bf16 %v3243_v40  ;;  %3328 = vrcp.f32 %v1835_v58 }
0x12b5   :  { %v3323_v13 = vpop.eup %3322  ;;  %v3130_v27 = vpack.c.bf16 %v3245_v3, %v3244_v14  ;;  %v2569_v3 = vld [vmem:[%s4362_s10 + $0x40] sm:$0xff]  ;;  %v2572_v14 = vld [vmem:[%s4362_s10 + $0x58] sm:$0xff] }
0x12b6   :  { %v3238_v34 = vpop.permute.xlu0 %3237  ;;  %v1840_v6 = vmul.f32 %v3323_v13, %v3317_v30  ;;  %v3325_v62 = vpop.eup %3324  ;;  %v3150_v11 = vpack.c.bf16 %v2570_v22, %v2569_v3 }
0x12b7   :  { %v3240_v42 = vunpack.i.h.bf16 %v3238_v34  ;;  %v3239_v24 = vunpack.i.l.bf16 %v3238_v34  ;;  %v1841_v36 = vmul.f32 %v3325_v62, %v3315_v53  ;;  %v1966_v61 = vpop.permute.xlu1 %1965  ;;  %v2575_v62 = vld [vmem:[%s4362_s10 + $0x70] sm:$0xff] }
0x12b8   :  { %2919 = vmatprep.mubr.msk.f32.mxu0 %vm436_vm15, %v1840_v6  ;;  %v1987_v18 = vsel %vm318_vm1, %v4192_v59, %v1966_v61 }
0x12b9   :  { %v3126_v26 = vpack.c.bf16 %v3240_v42, %v3239_v24  ;;  %v3327_v25 = vpop.eup %3326  ;;  %v3154_v42 = vpack.c.bf16 %v2572_v14, %v2571_v41  ;;  %v2573_v24 = vld [vmem:[%s4362_s10 + $0x60] sm:$0xff] }
0x12ba   :  { %v1842_v37 = vmul.f32 %v3327_v25, %v3319_v1  ;;  %v1968_v60 = vpop.permute.xlu0 %1967  ;;  %v3146_v1 = vpack.c.bf16 %v2564_v32, %v2563_v0  ;;  %v2576_v25 = vld [vmem:[%s4362_s10 + $0x78] sm:$0xff]  ;;  %v3373_v0 = vmov 0.0  }
0x12bb   :  { %3127 = vmatprep.subr.bf16.mxu0 %v3126_v26  ;;  %v1988_v7 = vsel %vm318_vm1, %v4190_v16, %v1968_v60 }
0x12bc   :  { %3129 = vmatpush3.bf16.msra.mxu0 %v3126_v26  ;;  %v2574_v26 = vld [vmem:[%s4362_s10 + $0x68] sm:$0xff] }
0x12bd   :  { %3131 = vmatprep.subr.bf16.mxu0 %v3130_v27  ;;  %v3329_v19 = vpop.eup %3328 }
0x12be   :  { %v1843_v63 = vmul.f32 %v3329_v19, %v3321_v43 }
0x12c0   :  { %3133 = vmatpush3.bf16.msra.mxu0 %v3130_v27  ;;  %v3158_v27 = vpack.c.bf16 %v2574_v26, %v2573_v24 }
0x12c1   :  { %3135 = vmatprep.subr.bf16.mxu0 %v3134_v9 }
0x12c3   :  { %2920 = vmatmul.mubr.msk.f32.vlgmr.msra.gmra.mrb[18].mxu0 %vm436_vm15, %v1841_v36  ;;  %v3162_v36 = vpack.c.bf16 %v2576_v25, %v2575_v62 }
0x12c4   :  { %2922 = vmatprep.mubr.msk.f32.mxu0 %vm436_vm15, %v1842_v37  ;;  %3137 = vmatpush3.bf16.msra.mxu0 %v3134_v9 }
0x12c5   :  { %3139 = vmatprep.subr.bf16.mxu0 %v3138_v35 }
0x12c7   :  { %2923 = vmatmul.mubr.msk.f32.gmra.mrb[20].mxu0 %vm436_vm15, %v1843_v63 }
0x12c8   :  { %3141 = vmatpush3.bf16.msra.mxu0 %v3138_v35 }
0x12c9   :  { %3151 = vmatprep.subr.bf16.mxu0 %v3150_v11 }
0x1396   :  { %v2921_v48 = vpop.f32.mrb[18].mxu0 }
0x1397   :  { %1975 = vrot.lane.b32.xlu0 %v2921_v48, %s3371_s19  ;;  %v1944_v45 = vpop.f32.mrb[19].mxu0 }
0x1398   :  { %1973 = vrot.lane.b32.xlu1 %v1944_v45, %s3371_s19 }
0x139a   :  { %v2924_v50 = vpop.f32.mrb[20].mxu0 }
0x139b   :  { %1983 = vrot.lane.b32.xlu0 %v2924_v50, %s3372_s22  ;;  %v1954_v51 = vpop.f32.mrb[21].mxu0 }
0x139c   :  { %1981 = vrot.lane.b32.xlu1 %v1954_v51, %s3372_s22 }
0x1409   :  { %v1976_v10 = vpop.permute.xlu0 %1975 }
0x140a   :  { %v1974_v17 = vpop.permute.xlu1 %1973  ;;  %v1990_v21 = vsel %vm276_vm3, %v1988_v7, %v1976_v10 }
0x140b   :  { %v1989_v47 = vsel %vm276_vm3, %v1987_v18, %v1974_v17 }
0x140d   :  { %v1984_v20 = vpop.permute.xlu0 %1983 }
0x140e   :  { %v1982_v8 = vpop.permute.xlu1 %1981  ;;  %v1992_v12 = vsel %vm902_vm4, %v1990_v21, %v1984_v20 }
0x140f   :  { %v1991_v39 = vsel %vm902_vm4, %v1989_v47, %v1982_v8 }
0x1410   :  { %2933 = vmatprep.mubr.msk.f32.mxu0 %vm104_vm0, %v1991_v39 }
0x1411   :  { %2934 = vmatmul.mubr.msk.f32.vlgmr.msra.gmra.mrb[22].mxu0 %vm104_vm0, %v1992_v12  ;;  %v2331_v12 = vld [vmem:[%s4364_s12 + $0x8] sm:$0xff] }
0x1412   :  { %3153 = vmatpush3.bf16.msra.mxu0 %v3150_v11 }
0x1413   :  { %3155 = vmatprep.subr.bf16.mxu0 %v3154_v42 }
0x1416   :  { %3157 = vmatpush3.bf16.msra.mxu0 %v3154_v42 }
0x1417   :  { %3159 = vmatprep.subr.bf16.mxu0 %v3158_v27 }
0x141a   :  { %3161 = vmatpush3.bf16.msra.mxu0 %v3158_v27 }
0x141b   :  { %3163 = vmatprep.subr.bf16.mxu0 %v3162_v36 }
0x141e   :  { %3165 = vmatpush3.bf16.msra.mxu0 %v3162_v36 }
0x14e4   :  { %v2935_v15 = vpop.f32.mrb[22].mxu0 }
0x14e5   :  { %v4249_v59 = vadd.f32 %v2935_v15, %v3996_v29  ;;  %v2070_v23 = vpop.f32.mrb[23].mxu0  ;;  %v2561_v29 = vld [vmem:[%s4361_s9 + $0x20] sm:$0xff]  ;;  %v2333_v15 = vld [vmem:[%s4364_s12 + $0x18] sm:$0xff] }
0x14e6   :  { %v4252_v16 = vadd.f32 %v2070_v23, %v3999_v31  ;;  %v2562_v31 = vld [vmem:[%s4361_s9 + $0x28] sm:$0xff]  ;;  %v2330_v23 = vld [vmem:[%s4364_s12] sm:$0xff] }
0x14e7   :  { %v2082_v28 = vmul.f32 %v4249_v59, %v4249_v59  ;;  %v3142_v30 = vpack.c.bf16 %v2562_v31, %v2561_v29  ;;  %v2334_v29 = vld [vmem:[%s4364_s12 + $0x20] sm:$0xff]  ;;  %v2336_v31 = vld [vmem:[%s4364_s12 + $0x30] sm:$0xff] }
0x14e8   :  { %v2081_v46 = vmul.f32 %v4252_v16, %v4252_v16 }
0x14e9   :  { %v2086_v49 = vsel %vm104_vm0, %v2082_v28, 0.0  ;;  %3143 = vmatprep.subr.bf16.mxu1 %v3142_v30 }
0x14ea   :  { %2087 = vadd.xlane.f32.xlu0 %v2086_v49  ;;  %v2083_v53 = vsel %vm104_vm0, %v2081_v46, 0.0  ;;  %3145 = vmatpush3.bf16.msra.mxu1 %v3142_v30  ;;  %v2335_v46 = vld [vmem:[%s4364_s12 + $0x28] sm:$0xff]  ;;  %v2337_v49 = vld [vmem:[%s4364_s12 + $0x38] sm:$0xff]  ;;  %v3172_v30 = vpack.c.bf16 %v2336_v31, %v2334_v29 }
0x14eb   :  { %2084 = vadd.xlane.f32.xlu1 %v2083_v53  ;;  %3147 = vmatprep.subr.bf16.mxu1 %v3146_v1  ;;  %v3170_v53 = vpack.c.bf16 %v2337_v49, %v2335_v46 }
0x14ee   :  { %3149 = vmatpush3.bf16.msra.mxu1 %v3146_v1 }
0x1577   :  { %v2088_v38 = vpop.xlane.xlu0 %2087 }
0x1578   :  { %v2090_v43 = vmul.f32 0.03125, %v2088_v38  ;;  %v2085_v52 = vpop.xlane.xlu1 %2084 }
0x1579   :  { %v2089_v54 = vmul.f32 0.03125, %v2085_v52 }
0x157a   :  { %v2092_v2 = vadd.f32 1e-05, %v2090_v43 }
0x157b   :  { %v2091_v44 = vadd.f32 1e-05, %v2089_v54 }
0x157c   :  { %3330 = vrsqrt.f32 %v2092_v2 }
0x157d   :  { %3332 = vrsqrt.f32 %v2091_v44 }
0x1586   :  { %v3331_v5 = vpop.eup %3330 }
0x1587   :  { %v3333_v58 = vpop.eup %3332  ;;  %v2096_v40 = vmul.f32 %v3331_v5, %v4249_v59  ;;  %v2579_v5 = vld [vmem:[%s4363_s11] ss:$0 sm:$0xff] }
0x1588   :  { %v2095_v13 = vmul.f32 %v3333_v58, %v4252_v16 }
0x1589   :  { %v2102_v6 = vmul.f32 %v2100_v55, %v2096_v40 }
0x158a   :  { %v2101_v34 = vmul.f32 %v2100_v55, %v2095_v13 }
0x158c   :  { %2944 = vmatprep.mubr.msk.f32.mxu1 %vm104_vm0, %v2101_v34 }
0x158d   :  { %2945 = vmatmul.mubr.msk.f32.vlgmr.msra.gmra.mrb[20].mxu1 %vm104_vm0, %v2102_v6 }
0x158e   :  { %2408 = vmatprep.mubr.f32.mxu1 %v3373_v0 }
0x1660   :  { %v2946_v19 = vpop.f32.mrb[20].mxu1 }
0x1661   :  { %2207 = vrot.lane.b32.xlu1 %v2946_v19, %s3364_s21  ;;  %v2180_v37 = vpop.f32.mrb[21].mxu1  ;;  %v2568_v4 = vmul.f32 -1.442695, %v2946_v19 }
0x1662   :  { %2205 = vrot.lane.b32.xlu0 %v2180_v37, %s3364_s21  ;;  %v2567_v63 = vmul.f32 -1.442695, %v2180_v37 }
0x1664   :  { %3334 = vpow2.f32 %v2567_v63 }
0x1665   :  { %3336 = vpow2.f32 %v2568_v4 }
0x166e   :  { %v3335_v33 = vpop.eup %3334 }
0x166f   :  { %v3337_v9 = vpop.eup %3336  ;;  %v2195_v57 = vadd.f32 1.0, %v3335_v33 }
0x1670   :  { %v2196_v56 = vadd.f32 1.0, %v3337_v9 }
0x1671   :  { %3338 = vrcp.f32 %v2195_v57 }
0x1672   :  { %3340 = vrcp.f32 %v2196_v56 }
0x167b   :  { %v3339_v35 = vpop.eup %3338 }
0x167c   :  { %v3341_v48 = vpop.eup %3340  ;;  %v2201_v50 = vmul.f32 %v3339_v35, %v2180_v37 }
0x167d   :  { %v2202_v51 = vmul.f32 %v3341_v48, %v2946_v19 }
0x16d3   :  { %v2208_v45 = vpop.permute.xlu1 %2207 }
0x16d4   :  { %v2206_v60 = vpop.permute.xlu0 %2205  ;;  %v2212_v10 = vmul.f32 %v2208_v45, %v2202_v51 }
0x16d5   :  { %v2211_v61 = vmul.f32 %v2206_v60, %v2201_v50 }
0x16d7   :  { %2963 = vmatprep.mubr.msk.f32.mxu0 %vm1131_vm5, %v2211_v61 }
0x16d8   :  { %2964 = vmatmul.mubr.msk.f32.vlgmr.msra.gmra.mrb[24].mxu0 %vm1131_vm5, %v2212_v10 }
0x17ab   :  { %v2965_v17 = vpop.f32.mrb[24].mxu0 }
0x17ac   :  { %v2304_v18 = vadd.f32 %v2965_v17, %v4249_v59  ;;  %v2294_v20 = vpop.f32.mrb[25].mxu0  ;;  %v3166_v59 = vpack.c.bf16 %v2333_v15, %v2331_v12 }
0x17ad   :  { %v2303_v7 = vadd.f32 %v2294_v20, %v4252_v16  ;;  %v2332_v16 = vld [vmem:[%s4364_s12 + $0x10] sm:$0xff] }
0x17ae   :  { %v2307_v47 = vmul.f32 %v2304_v18, %v2304_v18  ;;  %v3168_v28 = vpack.c.bf16 %v2332_v16, %v2330_v23  ;;  %3167 = vmatprep.subr.bf16.mxu1 %v3166_v59 }
0x17af   :  { %v2306_v8 = vmul.f32 %v2303_v7, %v2303_v7 }
0x17b0   :  { %v2311_v21 = vsel %vm104_vm0, %v2307_v47, 0.0  ;;  %3169 = vmatpush1.bf16.msra.mxu1 %v3168_v28 }
0x17b1   :  { %2312 = vadd.xlane.f32.xlu0 %v2311_v21  ;;  %v2308_v39 = vsel %vm104_vm0, %v2306_v8, 0.0  ;;  %3171 = vmatprep.subr.bf16.mxu1 %v3170_v53 }
0x17b2   :  { %2309 = vadd.xlane.f32.xlu1 %v2308_v39 }
0x17b4   :  { %3173 = vmatpush1.bf16.msra.mxu1 %v3172_v30 }
0x183e   :  { %v2313_v32 = vpop.xlane.xlu0 %2312 }
0x183f   :  { %v2315_v1 = vmul.f32 0.03125, %v2313_v32  ;;  %v2310_v38 = vpop.xlane.xlu1 %2309 }
0x1840   :  { %v2314_v43 = vmul.f32 0.03125, %v2310_v38 }
0x1841   :  { %v2317_v52 = vadd.f32 1e-05, %v2315_v1 }
0x1842   :  { %v2316_v54 = vadd.f32 1e-05, %v2314_v43 }
0x1843   :  { %3342 = vrsqrt.f32 %v2317_v52 }
0x1844   :  { %3344 = vrsqrt.f32 %v2316_v54 }
0x184d   :  { %v3343_v2 = vpop.eup %3342 }
0x184e   :  { %v3345_v44 = vpop.eup %3344  ;;  %v2321_v40 = vmul.f32 %v3343_v2, %v2304_v18 }
0x184f   :  { %v2320_v55 = vmul.f32 %v3345_v44, %v2303_v7 }
0x1850   :  { %v2329_v13 = vmul.f32 %v2579_v5, %v2321_v40 }
0x1851   :  { %v2328_v58 = vmul.f32 %v2579_v5, %v2320_v55 }
0x1853   :  { %2580 = vmatmul.mubr.msk.f32.vlgmr.msra.gmra.mrb[22].mxu1 %vm104_vm0, %v2328_v58 }
0x1854   :  { %2414 = vmatprep.mubr.f32.mxu1 %v3373_v0 }
0x1857   :  { %2581 = vmatmul.mubr.msk.f32.gmra.mrb[24].mxu1 %vm104_vm0, %v2329_v13 }
0x1926   :  { %v2410_v34 = vpop.f32.mrb[22].mxu1 }
0x1927   :  { %2421 = vst [vmem:[%s4365_s13] sm:$0xff] %v2410_v34  ;;  %v2412_v6 = vpop.f32.mrb[23].mxu1 }
0x1928   :  { %2422 = vst [vmem:[%s4365_s13 + $0x8] sm:$0xff] %v2412_v6 }
0x192a   :  { %v2416_v3 = vpop.f32.mrb[24].mxu1 }
0x192b   :  { %2423 = vst [vmem:[%s4365_s13 + $0x10] sm:$0xff] %v2416_v3  ;;  %v2418_v22 = vpop.f32.mrb[25].mxu1 }
0x192c   :  { %2424 = vst [vmem:[%s4365_s13 + $0x18] sm:$0xff] %v2418_v22 }
0x192d   :  { %2437 = vsyncpa [#allocation3], 1 }

</bundles_post_ra>
